<compile_context>
chip_gen: v5e
topology: v5e:2x2
jax: 0.10.0
libtpu: 0.0.40
codegen_flags: <defaults>
</compile_context>

<pallas_src>
import jax
import jax.numpy as jnp
from jax import lax
from jax.experimental import pallas as pl
from jax.experimental.pallas import tpu as pltpu


def _round_up(n, m):
    return ((n + m - 1) // m) * m


def tied_autoencoder_kernel(x_ref, w_ref, enc_ref, rec_ref):
    # x_ref:   (TB, INP)  VMEM tile of the input batch (pipelined per grid step)
    # w_ref:   (OUT, INP) full tied weight, VMEM-resident (single buffer)
    # enc_ref: (TB, OUT)  encoded features output tile
    # rec_ref: (TB, INP)  reconstruction output tile
    x = x_ref[...]
    w = w_ref[...]

    # encoded = x @ W^T : contract x's dim 1 with W's dim 1 (no explicit .T)
    enc = lax.dot_general(
        x, w,
        dimension_numbers=(((1,), (1,)), ((), ())),
        preferred_element_type=jnp.float32,
    )
    enc_ref[...] = enc.astype(enc_ref.dtype)

    # reconstructed = encoded @ W (tied decoder). Keep the f32 accumulator as
    # the LHS when W is f32; only downcast for a reduced-precision W path.
    dec_lhs = enc if w.dtype == jnp.float32 else enc.astype(w.dtype)
    rec = lax.dot_general(
        dec_lhs, w,
        dimension_numbers=(((1,), (0,)), ((), ())),
        preferred_element_type=jnp.float32,
    )
    rec_ref[...] = rec.astype(rec_ref.dtype)


def tied_autoencoder(x, w, *, block_b=None, compute_dtype=None):
    """x: (B, inp), w: (out, inp) -> (encoded (B, out), reconstructed (B, inp)).

    compute_dtype: optionally cast x/w (e.g. jnp.bfloat16) for the MXU; outputs
    and accumulation stay f32-accurate in the original dtype.
    """
    B, inp = x.shape
    out, inp_w = w.shape
    assert inp == inp_w, "weight inner dim must match input features"
    out_dtype = x.dtype

    if compute_dtype is not None:
        x = x.astype(compute_dtype)
        w = w.astype(compute_dtype)

    # Pad feature dims to lane-friendly multiples of 128. Zero-padding is
    # exact: padded W rows produce zero latent cols, padded W cols produce
    # recon cols we slice off.
    inp_p = _round_up(inp, 128)
    out_p = _round_up(out, 128)
    if (inp_p, out_p) != (inp, out):
        x = jnp.pad(x, ((0, 0), (0, inp_p - inp)))
        w = jnp.pad(w, ((0, out_p - out), (0, inp_p - inp)))

    if block_b is None:
        # Fill the MXU M dimension; cap so x/enc/rec tiles (double-buffered)
        # plus the resident W stay comfortably inside VMEM. Sweep upward if
        # VMEM allows.
        block_b = min(B, 256)
    grid = (pl.cdiv(B, block_b),)
    # Note: the final partial batch tile (if B % block_b != 0) is clipped on
    # writeback by Pallas; padded rows never reach HBM.

    in_itemsize = jnp.dtype(x.dtype).itemsize
    out_itemsize = jnp.dtype(out_dtype).itemsize
    w_bytes = out_p * inp_p * in_itemsize                      # single-buffered
    tile_bytes = block_b * (inp_p * in_itemsize                # x tile
                            + out_p * out_itemsize             # enc tile
                            + inp_p * out_itemsize)            # rec tile
    vmem_needed = w_bytes + 2 * tile_bytes                     # tiles double-buffered
    vmem_limit = None
    if vmem_needed > 30 * 1024 * 1024:
        vmem_limit = int(min(vmem_needed + vmem_needed // 4, 100 * 1024 * 1024))

    cost = pl.CostEstimate(
        flops=4 * B * inp_p * out_p,          # two (B, inp, out) matmuls
        transcendentals=0,
        bytes_accessed=(B * inp_p + out_p * inp_p) * in_itemsize
        + B * (out_p + inp_p) * out_itemsize,
    )

    enc_shape = jax.ShapeDtypeStruct((B, out_p), out_dtype)
    rec_shape = jax.ShapeDtypeStruct((B, inp_p), out_dtype)

    enc, rec = pl.pallas_call(
        tied_autoencoder_kernel,
        out_shape=(enc_shape, rec_shape),
        grid_spec=pltpu.PrefetchScalarGridSpec(
            num_scalar_prefetch=0,
            grid=grid,
            in_specs=[
                # x: one batch tile per grid step (pipelined, double-buffered)
                pl.BlockSpec((block_b, inp_p), lambda i: (i, 0)),
                # W: whole array, VMEM-resident, single buffer (grid-invariant)
                pl.BlockSpec(memory_space=pltpu.MemorySpace.VMEM),
            ],
            out_specs=[
                pl.BlockSpec((block_b, out_p), lambda i: (i, 0)),
                pl.BlockSpec((block_b, inp_p), lambda i: (i, 0)),
            ],
        ),
        compiler_params=pltpu.CompilerParams(
            dimension_semantics=("parallel",),   # batch tiles shard across TCs
            vmem_limit_bytes=vmem_limit,
        ),
        cost_estimate=cost,
    )(x, w)

    if out_p != out:
        enc = enc[:, :out]
    if inp_p != inp:
        rec = rec[:, :inp]
    return enc, rec


if __name__ == "__main__":
    # Small but MXU-friendly shapes: batch=256, inp=512 features, out=256 latent.
    B, INP, OUT = 256, 512, 256

    key = jax.random.PRNGKey(0)
    kx, kw = jax.random.split(key)
    x = jax.random.normal(kx, (B, INP), dtype=jnp.float32)
    # Deterministic init of the tied encoder weight (shape (out, inp), like nn.Linear).
    w = jax.random.normal(kw, (OUT, INP), dtype=jnp.float32) * 0.02

    # block_b=128 -> grid=(2,): both v7x TensorCores get a batch tile.
    encoded, reconstructed = tied_autoencoder(x, w, block_b=128)
    jax.block_until_ready((encoded, reconstructed))

    # Reference check against plain JAX (same math as the PyTorch module).
    enc_ref = jnp.matmul(x, w.T, precision=lax.Precision.HIGHEST)
    rec_ref = jnp.matmul(enc_ref, w, precision=lax.Precision.HIGHEST)
    assert encoded.shape == (B, OUT) and reconstructed.shape == (B, INP)
    assert jnp.allclose(encoded, enc_ref, atol=1e-3, rtol=1e-3)
    assert jnp.allclose(reconstructed, rec_ref, atol=1e-3, rtol=1e-3)

    print("KERNEL_OK")
</pallas_src>

<mosaic_0001>
module attributes {stable_mosaic.version = 11 : i64} {
  func.func @tied_autoencoder_kernel(%arg0: i32, %arg1: memref<128x512xf32, #tpu.memory_space<vmem>>, %arg2: memref<256x512xf32, #tpu.memory_space<vmem>>, %arg3: memref<128x256xf32, #tpu.memory_space<vmem>>, %arg4: memref<128x512xf32, #tpu.memory_space<vmem>>) attributes {dimension_semantics = [#tpu.dimension_semantics<parallel>], iteration_bounds = array<i64: 2>, scalar_prefetch = 0 : i64, scratch_operands = 0 : i64, tpu.core_type = #tpu.core_type<tc>, window_params = [{transform_indices = @transform_0, window_bounds = array<i64: 128, 512>}, {pipeline_mode = #tpu.pipeline_mode<synchronous>, transform_indices = @transform_1, window_bounds = array<i64: 256, 512>}, {transform_indices = @transform_2, window_bounds = array<i64: 128, 256>}, {transform_indices = @transform_3, window_bounds = array<i64: 128, 512>}]} {
    %c0 = arith.constant 0 : index
    %c0_0 = arith.constant 0 : index
    %0 = vector.load %arg1[%c0, %c0_0] : memref<128x512xf32, #tpu.memory_space<vmem>>, vector<128x512xf32>
    %c0_1 = arith.constant 0 : index
    %c0_2 = arith.constant 0 : index
    %1 = vector.load %arg2[%c0_1, %c0_2] : memref<256x512xf32, #tpu.memory_space<vmem>>, vector<256x512xf32>
    %cst = arith.constant dense<0.000000e+00> : vector<128x256xf32>
    %2 = tpu.matmul %0, %1, %cst {dimension_numbers = #tpu.dot_dimension_numbers<[1], [1], [0], [0], [0, 0, 1, 0], [], []>} : vector<128x512xf32>, vector<256x512xf32>, vector<128x256xf32> -> vector<128x256xf32>
    %c0_3 = arith.constant 0 : index
    %c0_4 = arith.constant 0 : index
    %3 = vector.load %arg3[%c0_3, %c0_4] : memref<128x256xf32, #tpu.memory_space<vmem>>, vector<128x256xf32>
    tpu.vector_store %arg3[%c0_3, %c0_4], %2 {strides = array<i32>} : memref<128x256xf32, #tpu.memory_space<vmem>>, vector<128x256xf32>,
    %cst_5 = arith.constant dense<0.000000e+00> : vector<128x512xf32>
    %4 = tpu.matmul %2, %1, %cst_5 {dimension_numbers = #tpu.dot_dimension_numbers<[1], [0], [0], [1], [0, 0, 1, 1], [], []>} : vector<128x256xf32>, vector<256x512xf32>, vector<128x512xf32> -> vector<128x512xf32>
    %c0_6 = arith.constant 0 : index
    %c0_7 = arith.constant 0 : index
    %5 = vector.load %arg4[%c0_6, %c0_7] : memref<128x512xf32, #tpu.memory_space<vmem>>, vector<128x512xf32>
    tpu.vector_store %arg4[%c0_6, %c0_7], %4 {strides = array<i32>} : memref<128x512xf32, #tpu.memory_space<vmem>>, vector<128x512xf32>,
    return
  }
  func.func @transform_0(%arg0: i32) -> (i32, i32) {
    %c0_i32 = arith.constant 0 : i32
    %c0_i32_0 = arith.constant 0 : i32
    return %arg0, %c0_i32 : i32, i32
  }
  func.func @transform_1(%arg0: i32) -> (i32, i32) {
    %c0_i32 = arith.constant 0 : i32
    %c0_i32_0 = arith.constant 0 : i32
    %c0_i32_1 = arith.constant 0 : i32
    return %c0_i32, %c0_i32_0 : i32, i32
  }
  func.func @transform_2(%arg0: i32) -> (i32, i32) {
    %c0_i32 = arith.constant 0 : i32
    %c0_i32_0 = arith.constant 0 : i32
    return %arg0, %c0_i32 : i32, i32
  }
  func.func @transform_3(%arg0: i32) -> (i32, i32) {
    %c0_i32 = arith.constant 0 : i32
    %c0_i32_0 = arith.constant 0 : i32
    return %arg0, %c0_i32 : i32, i32
  }
}

</mosaic_0001>

<bundles_post_ra>
// kernel: tpu_custom_call.1
= control target key start
LH: loop header
LB: loop body
LE: loop exit
PB: predicated region body
PF: predicated region fallthrough
CT: control target
= control target key end

     0   :  { %9 = vsyncpa [#allocation3], 0  ;;  %s3319_s0 = inlined_call_operand.hbm [shape: f32[256,512], index: 0, kind: input, shape index: {}]   ;;  %s3320_s1 = inlined_call_operand.hbm [shape: f32[256,512], index: 1, kind: input, shape index: {}]   ;;  %s3321_s2 = inlined_call_operand.hbm [shape: f32[256,256], index: 2, kind: output, shape index: {0}]   ;;  %s3322_s3 = inlined_call_operand.hbm [shape: f32[256,512], index: 3, kind: output, shape index: {1}]  }
   0x1   :  { %11 = vsyncpa [#allocation3 + $0x1], 0 }
   0x2   :  { %12 = vsyncpa [#allocation6], 0 }
   0x3   :  { %13 = vsyncpa [#allocation4], 0 }
   0x4   :  { %15 = vsyncpa [#allocation4 + $0x1], 0 }
   0x5   :  { %16 = vsyncpa [#allocation9], 0 }
   0x6   :  { %18 = vsyncpa [#allocation9 + $0x1], 0  ;;  %s1995_s12 = smov 0   ;;  %s1997_s13 = smov 0  }
   0x7   :  { %s1999_s14 = smov 0   ;;  %s2001_s15 = smov 0  }
   0x8 LB: > { %s2016_s16 = sadd.s32 4294967295, %s1966_s15   ;;  %s1707_s17 = sadd.s32 4294967294, %s1966_s15   ;;  %s1966_s15 = sphi %s2001_s15, %s3680_s15   ;;  %s1962_s14 = sphi %s1999_s14, %s3679_s14   ;;  %s1958_s13 = sphi %s1997_s13, %s3678_s13   ;;  %s1954_s12 = sphi %s1995_s12, %s3677_s12  }
   0x9   : > { %p44_p0 = scmp.ne.s32.totalorder %s1958_s13, %s1954_s12  ;;  %p45_p1 = scmp.eq.s32.totalorder %s2016_s16, 0 }
   0xa   : > { %p89_p2 = scmp.eq.s32.totalorder %s2016_s16, 1  ;;  %p95_p3 = scmp.eq.s32.totalorder %s1707_s17, 1 }
   0xb   : > { %p2025_p4 = por %p45_p1, %p44_p0  ;;  %p1708_p5 = scmp.ge.s32.totalorder %s1966_s15, 1 }
   0xc   : > { %p2030_p6 = por %p95_p3, %p44_p0  ;;  %p128_p7 = scmp.lt.s32.totalorder %s1966_s15, 3 }
   0xd   : > { %s139_s22 = sshll.u32 %s3320_s1, 4  ;;  %s1968_s24 = smov [#allocation5]   ;;  %s140_s22 = int_to_ptr.hbm [resolvable:$true] %s139_s22 }
   0xe   : > { %p2038_p8 = pnand %p1708_p5, %p128_p7  ;;  %s141_s25 = sshll.u32 %s1968_s24, 4  ;;  %s142_s25 = int_to_ptr.vmem [resolvable:$true] %s141_s25 }
   0xf   : > { %s2048_s26 = sadd.s32 1, %s1966_s15   ;;  %s1969_s27 = smov 512  }
  0x10   : > { %p1746_p9 = pneg %p2038_p8  ;;  %s1970_s28 = smov 32  }
  0x11   : > { %s28_s29 = ssub.s32 %s1966_s15, %s2048_s26  ;;  %s31_s30 = sadd.s32 1, %s1962_s14 }
  0x12   : > { %p1747_p10 = pnand %p1746_p9, %p45_p1  ;;  %p29_p12 = scmp.eq.s32.totalorder %s28_s29, 0 }
  0x13   : > { %p38_p13 = scmp.ne.s32.totalorder %s1962_s14, %s1958_s13  ;;  %p39_p0 = scmp.eq.s32.totalorder %s1966_s15, 0 }
  0x14   : > { %1749 = dma.hbm_to_vmem [thread:$0]  (!%p1747_p10), %s140_s22, 16384, %s142_s25, [#allocation6], %s1969_s27, %s1969_s27, %s1970_s28  }
  0x15   : > { %s2060_s4 = scalar_select %p29_p12, %s1962_s14, %s31_s30  }
  0x16   : > { %p2064_p3 = por %p89_p2, %p38_p13  ;;  %p1762_p5 = scmp.lt.s32.totalorder %s1966_s15, 2 }
  0x17   : > { %s155_s6 = sand.u32 1, %s1962_s14   ;;  %s1731_s7 = sshll.u32 %s1966_s15, 9 }
  0x18   : > { %p40_p7 = por %p39_p0, %p38_p13  ;;  %s1711_s8 = sshll.u32 %s155_s6, 9 }
  0x19   : > { %s165_s11 = scalar_lea.hbm %s3319_s0, %s1731_s7  ;;  %s159_s20 = scalar_lea.vmem [#allocation2], %s1711_s8 }
  0x1a   : > { %s166_s17 = sshll.u32 %s165_s11, 4  ;;  %s168_s21 = sshll.u32 %s159_s20, 4  ;;  %s167_s17 = int_to_ptr.hbm [resolvable:$true] %s166_s17  ;;  %s169_s21 = int_to_ptr.vmem [resolvable:$true] %s168_s21 }
  0x1b   : > { %p2074_p9 = pnand %p1762_p5, %p40_p7  ;;  %s156_s24 = scalar_lea.sflag [#allocation3], %s155_s6 }
  0x1c   : > { %s1834_s25 = sshra.s32 %s167_s17, 4  ;;  %s1841_s8 = scalar_lea.hbm %s3319_s0, 1024  ;;  %s1835_s25 = int_to_ptr.hbm [resolvable:$true] %s1834_s25 }
  0x1d   : > { %s1836_s29 = scalar_lea.hbm %s1835_s25, 512  ;;  %p1838_p10 = pneg %p2074_p9 }
  0x1e   : > { %p1837_p2 = scmp.ne.s32.totalorder %s1835_s25, %s1836_s29  ;;  %p1842_p0 = scmp.lt.s32.totalorder %s1835_s25, %s3319_s0 }
  0x1f   : > { %p1843_p5 = scmp.lt.s32.totalorder %s1841_s8, %s1836_s29 }
  0x20   : > { %p1839_p12 = pnand %p1838_p10, %p1837_p2 }
  0x21   : > { %p1844_p7 = por %p1843_p5, %p1842_p0 }
  0x22   : > { %p1840_p13 = pneg %p1839_p12 }
  0x24   : > { %p1845_p11 = pnand %p1844_p7, %p1840_p13 }
  0x26   : > { %1848 = shalt.err (!%p1845_p11)
}
  0x27   : > { %1753 = dma.hbm_to_vmem [thread:$0]  (!%p2074_p9), %s167_s17, 8192, %s169_s21, %s156_s24, %s1969_s27, %s1969_s27, %s1970_s28  }
  0x28   : > { %180 = sbr.rel (%p2038_p8) target bundleno = 768 (0x300), region = 28 }
  0x2d   : > { %s2094_s6 = sand.u32 1, %s1958_s13  }
  0x2e   : > { %s1716_s11 = sshll.u32 %s2094_s6, 9  ;;  %s183_s20 = scalar_lea.sflag [#allocation3], %s2094_s6 }
  0x2f   : > { %s2100_s25 = scalar_lea.vmem [#allocation2], %s1716_s11 }
  0x30   : > { %1937 = dma.done.wait (%p2025_p4), %s183_s20, 8192  }
  0x31   : > { %1939 = vsyncadd (%p2025_p4), %s183_s20, 4294959104 }
  0x32   : > { %1941 = dma.done.wait (%p45_p1), [#allocation6], 16384  }
  0x33   : > { %1943 = vsyncadd (%p45_p1), [#allocation6], 4294950912  ;;  %v2110_v0 = vld [vmem:[#allocation5 + $0x1e0] sm:$0xff]  ;;  %v2112_v1 = vld [vmem:[#allocation5 + $0x1f0] sm:$0xff]  ;;  %s1718_s18 = sshll.u32 %s2094_s6, 8  ;;  %s3141_s27 = scalar_lea.vmem [#allocation8], %s1716_s11 }
  0x34   : > { %3444 = vst [vmem:[#allocation14_spill] sm:$0xff] %v2112_v1  ;;  %v2114_v2 = vld [vmem:[#allocation5 + $0x1f8] sm:$0xff]  ;;  %415 = vmatpush.xpose.msra.mxu0 %v2110_v0  ;;  %545 = vmatpush.xpose.msra.mxu2 %v2112_v1  ;;  %v2118_v3 = vld [vmem:[#allocation5 + $0x1e8] sm:$0xff]  ;;  %v2121_v4 = vld [vmem:[#allocation5 + $0x1c0] sm:$0xff]  ;;  %s2825_s23 = scalar_lea.vmem [#allocation7], %s1718_s18  ;;  %s1733_s28 = sshll.u32 %s2016_s16, 8 }
  0x35   : > { %3445 = vst [vmem:[#allocation15_spill] sm:$0xff] %v2114_v2  ;;  %610 = vmatpush.xpose.msra.mxu3 %v2114_v2  ;;  %480 = vmatpush.xpose.msra.mxu1 %v2118_v3  ;;  %v2124_v5 = vld [vmem:[#allocation5 + $0x1d0] sm:$0xff]  ;;  %v2126_v6 = vld [vmem:[#allocation5 + $0x1d8] sm:$0xff]  ;;  %v2128_v7 = vld [vmem:[#allocation5 + $0x1c8] sm:$0xff]  ;;  %s1569_s22 = scalar_lea.hbm %s3321_s2, %s1733_s28  ;;  %s1570_s24 = sshll.u32 %s2825_s23, 4  ;;  %s1571_s24 = int_to_ptr.vmem [resolvable:$true] %s1570_s24 }
  0x36   : > { %3446 = vst [vmem:[#allocation16_spill] sm:$0xff] %v2124_v5  ;;  %v2133_v8 = vld [vmem:[#allocation5 + $0x1a0] sm:$0xff]  ;;  %v2136_v9 = vld [vmem:[#allocation5 + $0x1b0] sm:$0xff]  ;;  %v2138_v10 = vld [vmem:[#allocation5 + $0x1b8] sm:$0xff]  ;;  %s1572_s29 = sshll.u32 %s1569_s22, 4  ;;  %s1552_s30 = scalar_lea.sflag [#allocation4], %s2094_s6  ;;  %s1573_s29 = int_to_ptr.hbm [resolvable:$true] %s1572_s29 }
  0x37   : > { %3447 = vst [vmem:[#allocation17_spill] sm:$0xff] %v2126_v6  ;;  %v2140_v11 = vld [vmem:[#allocation5 + $0x1a8] sm:$0xff]  ;;  %v2145_v12 = vld [vmem:[#allocation5 + $0x180] sm:$0xff]  ;;  %v2148_v13 = vld [vmem:[#allocation5 + $0x190] sm:$0xff]  ;;  %s1878_s7 = sshra.s32 %s1573_s29, 4  ;;  %s1884_s11 = scalar_lea.hbm %s3321_s2, 512  ;;  %s1879_s7 = int_to_ptr.hbm [resolvable:$true] %s1878_s7 }
  0x38   : > { %416 = vmatpush.xpose.msra.mxu0 %v2121_v4  ;;  %546 = vmatpush.xpose.msra.mxu2 %v2124_v5  ;;  %3448 = vst [vmem:[#allocation18_spill] sm:$0xff] %v2136_v9  ;;  %v2150_v14 = vld [vmem:[#allocation5 + $0x198] sm:$0xff]  ;;  %v2152_v15 = vld [vmem:[#allocation5 + $0x188] sm:$0xff]  ;;  %v2157_v16 = vld [vmem:[#allocation5 + $0x160] sm:$0xff]  ;;  %s1880_s8 = scalar_lea.hbm %s1879_s7, 256  ;;  %p1885_p11 = scmp.lt.s32.totalorder %s1879_s7, %s3321_s2 }
  0x39   : > { %611 = vmatpush.xpose.msra.mxu3 %v2126_v6  ;;  %481 = vmatpush.xpose.msra.mxu1 %v2128_v7  ;;  %3449 = vst [vmem:[#allocation19_spill] sm:$0xff] %v2138_v10  ;;  %v2160_v17 = vld [vmem:[#allocation5 + $0x170] sm:$0xff]  ;;  %v2162_v18 = vld [vmem:[#allocation5 + $0x178] sm:$0xff]  ;;  %v2164_v19 = vld [vmem:[#allocation5 + $0x168] sm:$0xff]  ;;  %p1881_p1 = scmp.ne.s32.totalorder %s1879_s7, %s1880_s8  ;;  %p1886_p9 = scmp.lt.s32.totalorder %s1884_s11, %s1880_s8 }
  0x3a   : > { %3450 = vst [vmem:[#allocation20_spill] sm:$0xff] %v2148_v13  ;;  %v2169_v20 = vld [vmem:[#allocation5 + $0x140] sm:$0xff]  ;;  %v2172_v21 = vld [vmem:[#allocation5 + $0x150] sm:$0xff]  ;;  %v2174_v22 = vld [vmem:[#allocation5 + $0x158] sm:$0xff] }
  0x3b   : > { %3451 = vst [vmem:[#allocation21_spill] sm:$0xff] %v2150_v14  ;;  %v2176_v23 = vld [vmem:[#allocation5 + $0x148] sm:$0xff]  ;;  %v2181_v24 = vld [vmem:[#allocation5 + $0x120] sm:$0xff]  ;;  %v2184_v25 = vld [vmem:[#allocation5 + $0x130] sm:$0xff]  ;;  %p1882_p4 = pnand %p1881_p1, %p2064_p3  ;;  %p1887_p2 = por %p1886_p9, %p1885_p11 }
  0x3c   : > { %417 = vmatpush.xpose.msra.mxu0 %v2133_v8  ;;  %547 = vmatpush.xpose.msra.mxu2 %v2136_v9  ;;  %3452 = vst [vmem:[#allocation22_spill] sm:$0xff] %v2160_v17  ;;  %v2186_v26 = vld [vmem:[#allocation5 + $0x138] sm:$0xff]  ;;  %v2188_v27 = vld [vmem:[#allocation5 + $0x128] sm:$0xff]  ;;  %v2193_v28 = vld [vmem:[#allocation5 + $0x100] sm:$0xff] }
  0x3d   : > { %612 = vmatpush.xpose.msra.mxu3 %v2138_v10  ;;  %482 = vmatpush.xpose.msra.mxu1 %v2140_v11  ;;  %3453 = vst [vmem:[#allocation23_spill] sm:$0xff] %v2162_v18  ;;  %v2196_v29 = vld [vmem:[#allocation5 + $0x110] sm:$0xff]  ;;  %v2198_v30 = vld [vmem:[#allocation5 + $0x118] sm:$0xff]  ;;  %v2200_v31 = vld [vmem:[#allocation5 + $0x108] sm:$0xff]  ;;  %p1883_p8 = pneg %p1882_p4 }
  0x3e   : > { %3454 = vst [vmem:[#allocation24_spill] sm:$0xff] %v2172_v21  ;;  %v2205_v32 = vld [vmem:[#allocation5 + $0xe0] sm:$0xff]  ;;  %v2208_v33 = vld [vmem:[#allocation5 + $0xf0] sm:$0xff]  ;;  %v2210_v34 = vld [vmem:[#allocation5 + $0xf8] sm:$0xff] }
  0x3f   : > { %3455 = vst [vmem:[#allocation25_spill] sm:$0xff] %v2174_v22  ;;  %v2212_v35 = vld [vmem:[#allocation5 + $0xe8] sm:$0xff]  ;;  %v2217_v36 = vld [vmem:[#allocation5 + $0xc0] sm:$0xff]  ;;  %v2220_v37 = vld [vmem:[#allocation5 + $0xd0] sm:$0xff]  ;;  %p1888_p10 = pnand %p1887_p2, %p1883_p8 }
  0x40   : > { %418 = vmatpush.xpose.msra.mxu0 %v2145_v12  ;;  %548 = vmatpush.xpose.msra.mxu2 %v2148_v13  ;;  %3456 = vst [vmem:[#allocation26_spill] sm:$0xff] %v2184_v25  ;;  %v2222_v38 = vld [vmem:[#allocation5 + $0xd8] sm:$0xff]  ;;  %v2224_v39 = vld [vmem:[#allocation5 + $0xc8] sm:$0xff]  ;;  %v2229_v40 = vld [vmem:[#allocation5 + $0xa0] sm:$0xff] }
  0x41   : > { %613 = vmatpush.xpose.msra.mxu3 %v2150_v14  ;;  %483 = vmatpush.xpose.msra.mxu1 %v2152_v15  ;;  %3457 = vst [vmem:[#allocation27_spill] sm:$0xff] %v2186_v26  ;;  %v2232_v41 = vld [vmem:[#allocation5 + $0xb0] sm:$0xff]  ;;  %v2234_v42 = vld [vmem:[#allocation5 + $0xb8] sm:$0xff]  ;;  %v2236_v43 = vld [vmem:[#allocation5 + $0xa8] sm:$0xff] }
  0x42   : > { %3458 = vst [vmem:[#allocation28_spill] sm:$0xff] %v2196_v29  ;;  %v2241_v44 = vld [vmem:[#allocation5 + $0x80] sm:$0xff]  ;;  %v2244_v45 = vld [vmem:[#allocation5 + $0x90] sm:$0xff]  ;;  %v2246_v46 = vld [vmem:[#allocation5 + $0x98] sm:$0xff] }
  0x43   : > { %3459 = vst [vmem:[#allocation29_spill] sm:$0xff] %v2198_v30  ;;  %v2248_v47 = vld [vmem:[#allocation5 + $0x88] sm:$0xff]  ;;  %v2253_v48 = vld [vmem:[#allocation5 + $0x60] sm:$0xff]  ;;  %v2256_v49 = vld [vmem:[#allocation5 + $0x70] sm:$0xff] }
  0x44   : > { %419 = vmatpush.xpose.msra.mxu0 %v2157_v16  ;;  %549 = vmatpush.xpose.msra.mxu2 %v2160_v17  ;;  %3460 = vst [vmem:[#allocation30_spill] sm:$0xff] %v2208_v33  ;;  %v2258_v50 = vld [vmem:[#allocation5 + $0x78] sm:$0xff]  ;;  %v2260_v51 = vld [vmem:[#allocation5 + $0x68] sm:$0xff]  ;;  %v2265_v52 = vld [vmem:[#allocation5 + $0x40] sm:$0xff] }
  0x45   : > { %614 = vmatpush.xpose.msra.mxu3 %v2162_v18  ;;  %484 = vmatpush.xpose.msra.mxu1 %v2164_v19  ;;  %3461 = vst [vmem:[#allocation31_spill] sm:$0xff] %v2210_v34  ;;  %v2268_v53 = vld [vmem:[#allocation5 + $0x50] sm:$0xff]  ;;  %v2270_v54 = vld [vmem:[#allocation5 + $0x58] sm:$0xff]  ;;  %v2272_v55 = vld [vmem:[#allocation5 + $0x48] sm:$0xff] }
  0x46   : > { %3462 = vst [vmem:[#allocation32_spill] sm:$0xff] %v2220_v37  ;;  %v2277_v56 = vld [vmem:[#allocation5 + $0x20] sm:$0xff]  ;;  %v2280_v57 = vld [vmem:[#allocation5 + $0x30] sm:$0xff]  ;;  %v2282_v58 = vld [vmem:[#allocation5 + $0x38] sm:$0xff] }
  0x47   : > { %3463 = vst [vmem:[#allocation33_spill] sm:$0xff] %v2222_v38  ;;  %v2284_v59 = vld [vmem:[#allocation5 + $0x28] sm:$0xff]  ;;  %v2289_v60 = vld [vmem:[#allocation5] sm:$0xff]  ;;  %v2292_v61 = vld [vmem:[#allocation5 + $0x10] sm:$0xff] }
  0x48   : > { %420 = vmatpush.xpose.msra.mxu0 %v2169_v20  ;;  %550 = vmatpush.xpose.msra.mxu2 %v2172_v21  ;;  %3464 = vst [vmem:[#allocation34_spill] sm:$0xff] %v2232_v41  ;;  %v2294_v62 = vld [vmem:[#allocation5 + $0x18] sm:$0xff]  ;;  %v2296_v63 = vld [vmem:[#allocation5 + $0x3f0] sm:$0xff]  ;;  %v2366_v21 = vld [vmem:[#allocation5 + $0x3a8] sm:$0xff] }
  0x49   : > { %615 = vmatpush.xpose.msra.mxu3 %v2174_v22  ;;  %485 = vmatpush.xpose.msra.mxu1 %v2176_v23  ;;  %3465 = vst [vmem:[#allocation35_spill] sm:$0xff] %v2234_v42  ;;  %v2368_v22 = vld [vmem:[#allocation5 + $0x398] sm:$0xff]  ;;  %v2374_v17 = vld [vmem:[#allocation5 + $0x380] sm:$0xff]  ;;  %v2378_v18 = vld [vmem:[#allocation5 + $0x370] sm:$0xff] }
  0x4a   : > { %3466 = vst [vmem:[#allocation36_spill] sm:$0xff] %v2244_v45  ;;  %v2380_v13 = vld [vmem:[#allocation5 + $0x388] sm:$0xff]  ;;  %v2382_v14 = vld [vmem:[#allocation5 + $0x378] sm:$0xff]  ;;  %v2388_v9 = vld [vmem:[%s2100_s25 + $0x50] sm:$0xff] }
  0x4b   : > { %3467 = vst [vmem:[#allocation37_spill] sm:$0xff] %v2246_v46  ;;  %v2398_v10 = vld [vmem:[%s2100_s25 + $0x48] sm:$0xff]  ;;  %v2422_v5 = vld [vmem:[#allocation5 + $0x338] sm:$0xff]  ;;  %v2446_v6 = vld [vmem:[#allocation5 + $0x310] sm:$0xff] }
  0x4c   : > { %421 = vmatpush.xpose.msra.mxu0 %v2181_v24  ;;  %551 = vmatpush.xpose.msra.mxu2 %v2184_v25  ;;  %3468 = vst [vmem:[#allocation38_spill] sm:$0xff] %v2256_v49  ;;  %v2358_v25 = vld [vmem:[%s2100_s25 + $0x28] sm:$0xff] }
  0x4d   : > { %616 = vmatpush.xpose.msra.mxu3 %v2186_v26  ;;  %486 = vmatpush.xpose.msra.mxu1 %v2188_v27  ;;  %3469 = vst [vmem:[#allocation39_spill] sm:$0xff] %v2258_v50  ;;  %v2362_v26 = vld [vmem:[#allocation5 + $0x390] sm:$0xff]  ;;  %v2514_v1 = vld [vmem:[#allocation5 + $0x2c8] sm:$0xff] }
  0x4e   : > { %3470 = vst [vmem:[#allocation40_spill] sm:$0xff] %v2268_v53  ;;  %v2542_v2 = vld [vmem:[#allocation5 + $0x2a8] sm:$0xff] }
  0x4f   : > { %3471 = vst [vmem:[#allocation41_spill] sm:$0xff] %v2270_v54 }
  0x50   : > { %422 = vmatpush.xpose.msra.mxu0 %v2193_v28  ;;  %552 = vmatpush.xpose.msra.mxu2 %v2196_v29  ;;  %3472 = vst [vmem:[#allocation42_spill] sm:$0xff] %v2277_v56  ;;  %v2352_v29 = vld [vmem:[%s2100_s25 + $0x38] sm:$0xff] }
  0x51   : > { %617 = vmatpush.xpose.msra.mxu3 %v2198_v30  ;;  %487 = vmatpush.xpose.msra.mxu1 %v2200_v31  ;;  %3473 = vst [vmem:[#allocation43_spill] sm:$0xff] %v2280_v57  ;;  %v2355_v30 = vld [vmem:[#allocation5 + $0x3a0] sm:$0xff] }
  0x52   : > { %3474 = vst [vmem:[#allocation44_spill] sm:$0xff] %v2282_v58 }
  0x53   : > { %3475 = vst [vmem:[#allocation45_spill] sm:$0xff] %v2284_v59 }
  0x54   : > { %423 = vmatpush.xpose.msra.mxu0 %v2205_v32  ;;  %553 = vmatpush.xpose.msra.mxu2 %v2208_v33  ;;  %3476 = vst [vmem:[#allocation46_spill] sm:$0xff] %v2289_v60  ;;  %v2345_v33 = vld [vmem:[%s2100_s25 + $0x20] sm:$0xff] }
  0x55   : > { %618 = vmatpush.xpose.msra.mxu3 %v2210_v34  ;;  %488 = vmatpush.xpose.msra.mxu1 %v2212_v35  ;;  %3477 = vst [vmem:[#allocation47_spill] sm:$0xff] %v2292_v61  ;;  %v2348_v34 = vld [vmem:[%s2100_s25 + $0x30] sm:$0xff] }
  0x56   : > { %3478 = vst [vmem:[#allocation48_spill] sm:$0xff] %v2294_v62 }
  0x57   : > { %3479 = vst [vmem:[#allocation49_spill] sm:$0xff] %v2296_v63 }
  0x58   : > { %424 = vmatpush.xpose.msra.mxu0 %v2217_v36  ;;  %554 = vmatpush.xpose.msra.mxu2 %v2220_v37  ;;  %v2340_v37 = vld [vmem:[#allocation5 + $0x3c8] sm:$0xff]  ;;  %3490 = vst [vmem:[#allocation60_spill] sm:$0xff] %v2345_v33 }
  0x59   : > { %619 = vmatpush.xpose.msra.mxu3 %v2222_v38  ;;  %489 = vmatpush.xpose.msra.mxu1 %v2224_v39  ;;  %v2342_v38 = vld [vmem:[#allocation5 + $0x3b8] sm:$0xff]  ;;  %3491 = vst [vmem:[#allocation61_spill] sm:$0xff] %v2348_v34 }
  0x5a   : > { %3489 = vst [vmem:[#allocation59_spill] sm:$0xff] %v2342_v38 }
  0x5b   : > { %3492 = vst [vmem:[#allocation62_spill] sm:$0xff] %v2352_v29 }
  0x5c   : > { %425 = vmatpush.xpose.msra.mxu0 %v2229_v40  ;;  %555 = vmatpush.xpose.msra.mxu2 %v2232_v41  ;;  %v2334_v41 = vld [vmem:[#allocation5 + $0x3c0] sm:$0xff]  ;;  %3493 = vst [vmem:[#allocation63_spill] sm:$0xff] %v2358_v25 }
  0x5d   : > { %620 = vmatpush.xpose.msra.mxu3 %v2234_v42  ;;  %490 = vmatpush.xpose.msra.mxu1 %v2236_v43  ;;  %v2338_v42 = vld [vmem:[#allocation5 + $0x3b0] sm:$0xff]  ;;  %3494 = vst [vmem:[#allocation64_spill] sm:$0xff] %v2362_v26 }
  0x5e   : > { %3488 = vst [vmem:[#allocation58_spill] sm:$0xff] %v2338_v42 }
  0x5f   : > { %3495 = vst [vmem:[#allocation65_spill] sm:$0xff] %v2368_v22 }
  0x60   : > { %426 = vmatpush.xpose.msra.mxu0 %v2241_v44  ;;  %556 = vmatpush.xpose.msra.mxu2 %v2244_v45  ;;  %v2320_v45 = vld [vmem:[%s2100_s25 + $0x8] sm:$0xff]  ;;  %3496 = vst [vmem:[#allocation66_spill] sm:$0xff] %v2378_v18 }
  0x61   : > { %621 = vmatpush.xpose.msra.mxu3 %v2246_v46  ;;  %491 = vmatpush.xpose.msra.mxu1 %v2248_v47  ;;  %3485 = vst [vmem:[#allocation55_spill] sm:$0xff] %v2320_v45  ;;  %v2328_v46 = vld [vmem:[#allocation5 + $0x3d8] sm:$0xff] }
  0x62   : > { %3487 = vst [vmem:[#allocation57_spill] sm:$0xff] %v2328_v46 }
  0x63   : > { %3497 = vst [vmem:[#allocation67_spill] sm:$0xff] %v2382_v14 }
  0x64   : > { %427 = vmatpush.xpose.msra.mxu0 %v2253_v48  ;;  %557 = vmatpush.xpose.msra.mxu2 %v2256_v49  ;;  %v2313_v49 = vld [vmem:[%s2100_s25 + $0x18] sm:$0xff]  ;;  %3499 = vst [vmem:[#allocation69_spill] sm:$0xff] %v2388_v9 }
  0x65   : > { %622 = vmatpush.xpose.msra.mxu3 %v2258_v50  ;;  %492 = vmatpush.xpose.msra.mxu1 %v2260_v51  ;;  %3484 = vst [vmem:[#allocation54_spill] sm:$0xff] %v2313_v49  ;;  %v2315_v50 = vld [vmem:[#allocation5 + $0x3e0] sm:$0xff] }
  0x66   : > { %3501 = vst [vmem:[#allocation71_spill] sm:$0xff] %v2398_v10 }
  0x67   : > { %3505 = vst [vmem:[#allocation75_spill] sm:$0xff] %v2422_v5 }
  0x68   : > { %428 = vmatpush.xpose.msra.mxu0 %v2265_v52  ;;  %558 = vmatpush.xpose.msra.mxu2 %v2268_v53  ;;  %v2298_v53 = vld [vmem:[#allocation5 + $0x8] sm:$0xff]  ;;  %3510 = vst [vmem:[#allocation80_spill] sm:$0xff] %v2446_v6 }
  0x69   : > { %623 = vmatpush.xpose.msra.mxu3 %v2270_v54  ;;  %493 = vmatpush.xpose.msra.mxu1 %v2272_v55  ;;  %3480 = vst [vmem:[#allocation50_spill] sm:$0xff] %v2298_v53  ;;  %v2300_v54 = vld [vmem:[#allocation5 + $0x3f8] sm:$0xff] }
  0x6a   : > { %3481 = vst [vmem:[#allocation51_spill] sm:$0xff] %v2300_v54 }
  0x6c   : > { %429 = vmatpush.xpose.msra.mxu0 %v2277_v56  ;;  %559 = vmatpush.xpose.msra.mxu2 %v2280_v57  ;;  %v2305_v57 = vld [vmem:[%s2100_s25] sm:$0xff] }
  0x6d   : > { %624 = vmatpush.xpose.msra.mxu3 %v2282_v58  ;;  %494 = vmatpush.xpose.msra.mxu1 %v2284_v59  ;;  %3482 = vst [vmem:[#allocation52_spill] sm:$0xff] %v2305_v57  ;;  %v2308_v58 = vld [vmem:[%s2100_s25 + $0x10] sm:$0xff]  ;;  %v2596_v56 = vld [vmem:[#allocation5 + $0x260] sm:$0xff] }
  0x6e   : > { %3483 = vst [vmem:[#allocation53_spill] sm:$0xff] %v2308_v58  ;;  %v2624_v59 = vld [vmem:[#allocation5 + $0x240] sm:$0xff] }
  0x70   : > { %430 = vmatpush.xpose.msra.mxu0 %v2289_v60  ;;  %560 = vmatpush.xpose.msra.mxu2 %v2292_v61  ;;  %v2322_v61 = vld [vmem:[#allocation5 + $0x3d0] sm:$0xff]  ;;  %v2568_v60 = vld [vmem:[#allocation5 + $0x280] sm:$0xff] }
  0x71   : > { %625 = vmatpush.xpose.msra.mxu3 %v2294_v62  ;;  %495 = vmatpush.xpose.msra.mxu1 %v2298_v53  ;;  %3486 = vst [vmem:[#allocation56_spill] sm:$0xff] %v2322_v61  ;;  %v2326_v62 = vld [vmem:[#allocation5 + $0x3e8] sm:$0xff] }
  0x72   : > { %v2570_v53 = vld [vmem:[#allocation5 + $0x288] sm:$0xff] }
  0x73   : > { %431 = vmatmul.f32.vlgmr.msra.gmra.mxu0 %v2305_v57  ;;  %561 = vmatmul.f32.vlgmr.msra.gmra.mxu2 %v2308_v58  ;;  %v2652_v58 = vld [vmem:[#allocation5 + $0x220] sm:$0xff]  ;;  %v2654_v57 = vld [vmem:[#allocation5 + $0x228] sm:$0xff] }
  0x74   : > { %805 = vmatpush.xpose.msrb.mxu2 %v2296_v63  ;;  %626 = vmatmul.f32.vlgmr.msra.gmra.mxu3 %v2313_v49  ;;  %v2512_v63 = vld [vmem:[#allocation5 + $0x2c0] sm:$0xff]  ;;  %v2626_v49 = vld [vmem:[#allocation5 + $0x248] sm:$0xff]  ;;  %3554 = vst [vmem:[#allocation124_spill] sm:$0xff] %v2652_v58 }
  0x75   : > { %870 = vmatpush.xpose.msrb.mxu3 %v2300_v54  ;;  %675 = vmatpush.xpose.msrb.mxu0 %v2315_v50  ;;  %v2540_v54 = vld [vmem:[#allocation5 + $0x2a0] sm:$0xff]  ;;  %3555 = vst [vmem:[#allocation125_spill] sm:$0xff] %v2654_v57 }
  0x76   : > { %496 = vmatmul.f32.vlgmr.msra.gmra.mxu1 %v2320_v45  ;;  %v2598_v45 = vld [vmem:[#allocation5 + $0x268] sm:$0xff] }
  0x77   : > { %740 = vmatpush.xpose.msrb.mxu1 %v2326_v62 }
  0x78   : > { %806 = vmatpush.xpose.msrb.mxu2 %v2322_v61  ;;  %v2406_v61 = vld [vmem:[#allocation5 + $0x368] sm:$0xff] }
  0x79   : > { %871 = vmatpush.xpose.msrb.mxu3 %v2328_v46  ;;  %676 = vmatpush.xpose.msrb.mxu0 %v2334_v41  ;;  %v2428_v46 = vld [vmem:[%s2100_s25 + $0x70] sm:$0xff] }
  0x7a   : > { %3507 = vst [vmem:[#allocation77_spill] sm:$0xff] %v2428_v46 }
  0x7b   : > { %741 = vmatpush.xpose.msrb.mxu1 %v2340_v37  ;;  %434 = vmatmul.f32.gmra.mxu0 %v2345_v33  ;;  %v2486_v33 = vld [vmem:[#allocation5 + $0x2e8] sm:$0xff] }
  0x7c   : > { %807 = vmatpush.xpose.msrb.mxu2 %v2338_v42  ;;  %629 = vmatmul.f32.gmra.mxu3 %v2352_v29  ;;  %v2385_v42 = vld [vmem:[%s2100_s25 + $0x40] sm:$0xff]  ;;  %v2464_v29 = vld [vmem:[%s2100_s25 + $0x90] sm:$0xff] }
  0x7d   : > { %872 = vmatpush.xpose.msrb.mxu3 %v2342_v38  ;;  %564 = vmatmul.f32.gmra.mxu2 %v2348_v34  ;;  %3498 = vst [vmem:[#allocation68_spill] sm:$0xff] %v2385_v42  ;;  %v2392_v38 = vld [vmem:[%s2100_s25 + $0x58] sm:$0xff]  ;;  %v2484_v34 = vld [vmem:[#allocation5 + $0x2e0] sm:$0xff] }
  0x7e   : > { %677 = vmatpush.xpose.msrb.mxu0 %v2355_v30  ;;  %499 = vmatmul.f32.gmra.mxu1 %v2358_v25  ;;  %3500 = vst [vmem:[#allocation70_spill] sm:$0xff] %v2392_v38  ;;  %v2438_v25 = vld [vmem:[%s2100_s25 + $0x68] sm:$0xff] }
  0x7f   : > { %742 = vmatpush.xpose.msrb.mxu1 %v2366_v21  ;;  %3509 = vst [vmem:[#allocation79_spill] sm:$0xff] %v2438_v25 }
  0x80   : > { %808 = vmatpush.xpose.msrb.mxu2 %v2362_v26  ;;  %v2395_v26 = vld [vmem:[#allocation5 + $0x360] sm:$0xff]  ;;  %3513 = vst [vmem:[#allocation83_spill] sm:$0xff] %v2464_v29 }
  0x81   : > { %873 = vmatpush.xpose.msrb.mxu3 %v2368_v22  ;;  %v2402_v22 = vld [vmem:[#allocation5 + $0x350] sm:$0xff] }
  0x82   : > { %678 = vmatpush.xpose.msrb.mxu0 %v2374_v17  ;;  %3502 = vst [vmem:[#allocation72_spill] sm:$0xff] %v2402_v22 }
  0x83   : > { %743 = vmatpush.xpose.msrb.mxu1 %v2380_v13  ;;  %437 = vmatmul.f32.gmra.mxu0 %v2385_v42  ;;  %v2420_v42 = vld [vmem:[#allocation5 + $0x348] sm:$0xff] }
  0x84   : > { %809 = vmatpush.xpose.msrb.mxu2 %v2378_v18  ;;  %v2408_v18 = vld [vmem:[#allocation5 + $0x358] sm:$0xff]  ;;  %632 = vmatmul.f32.gmra.mxu3 %v2392_v38  ;;  %v2425_v38 = vld [vmem:[%s2100_s25 + $0x60] sm:$0xff] }
  0x85   : > { %874 = vmatpush.xpose.msrb.mxu3 %v2382_v14  ;;  %567 = vmatmul.f32.gmra.mxu2 %v2388_v9  ;;  %3503 = vst [vmem:[#allocation73_spill] sm:$0xff] %v2408_v18  ;;  %v2414_v14 = vld [vmem:[#allocation5 + $0x340] sm:$0xff]  ;;  %v2418_v9 = vld [vmem:[#allocation5 + $0x330] sm:$0xff] }
  0x86   : > { %679 = vmatpush.xpose.msrb.mxu0 %v2395_v26  ;;  %502 = vmatmul.f32.gmra.mxu1 %v2398_v10  ;;  %3504 = vst [vmem:[#allocation74_spill] sm:$0xff] %v2418_v9  ;;  %v2432_v10 = vld [vmem:[%s2100_s25 + $0x78] sm:$0xff] }
  0x87   : > { %744 = vmatpush.xpose.msrb.mxu1 %v2406_v61  ;;  %3506 = vst [vmem:[#allocation76_spill] sm:$0xff] %v2425_v38 }
  0x88   : > { %810 = vmatpush.xpose.msrb.mxu2 %v2402_v22  ;;  %3508 = vst [vmem:[#allocation78_spill] sm:$0xff] %v2432_v10  ;;  %v2435_v22 = vld [vmem:[#allocation5 + $0x320] sm:$0xff] }
  0x89   : > { %875 = vmatpush.xpose.msrb.mxu3 %v2408_v18  ;;  %v2444_v18 = vld [vmem:[#allocation5 + $0x328] sm:$0xff] }
  0x8a   : > { %680 = vmatpush.xpose.msrb.mxu0 %v2414_v14 }
  0x8b   : > { %745 = vmatpush.xpose.msrb.mxu1 %v2420_v42  ;;  %440 = vmatmul.f32.gmra.mxu0 %v2425_v38  ;;  %v2461_v38 = vld [vmem:[%s2100_s25 + $0x80] sm:$0xff] }
  0x8c   : > { %811 = vmatpush.xpose.msrb.mxu2 %v2418_v9  ;;  %635 = vmatmul.f32.gmra.mxu3 %v2432_v10  ;;  %v2450_v9 = vld [vmem:[#allocation5 + $0x318] sm:$0xff]  ;;  %3512 = vst [vmem:[#allocation82_spill] sm:$0xff] %v2461_v38 }
  0x8d   : > { %876 = vmatpush.xpose.msrb.mxu3 %v2422_v5  ;;  %570 = vmatmul.f32.gmra.mxu2 %v2428_v46  ;;  %3511 = vst [vmem:[#allocation81_spill] sm:$0xff] %v2450_v9  ;;  %v2454_v5 = vld [vmem:[#allocation5 + $0x300] sm:$0xff]  ;;  %v2458_v46 = vld [vmem:[#allocation5 + $0x308] sm:$0xff]  ;;  %v2468_v10 = vld [vmem:[%s2100_s25 + $0x98] sm:$0xff] }
  0x8e   : > { %681 = vmatpush.xpose.msrb.mxu0 %v2435_v22  ;;  %505 = vmatmul.f32.gmra.mxu1 %v2438_v25  ;;  %3514 = vst [vmem:[#allocation84_spill] sm:$0xff] %v2468_v10  ;;  %v2471_v25 = vld [vmem:[%s2100_s25 + $0x88] sm:$0xff] }
  0x8f   : > { %746 = vmatpush.xpose.msrb.mxu1 %v2444_v18  ;;  %3515 = vst [vmem:[#allocation85_spill] sm:$0xff] %v2471_v25 }
  0x90   : > { %812 = vmatpush.xpose.msrb.mxu2 %v2446_v6  ;;  %v2476_v6 = vld [vmem:[#allocation5 + $0x2f0] sm:$0xff] }
  0x91   : > { %877 = vmatpush.xpose.msrb.mxu3 %v2450_v9  ;;  %3516 = vst [vmem:[#allocation86_spill] sm:$0xff] %v2476_v6  ;;  %v2480_v9 = vld [vmem:[#allocation5 + $0x2f8] sm:$0xff] }
  0x92   : > { %682 = vmatpush.xpose.msrb.mxu0 %v2454_v5  ;;  %3517 = vst [vmem:[#allocation87_spill] sm:$0xff] %v2480_v9 }
  0x93   : > { %747 = vmatpush.xpose.msrb.mxu1 %v2458_v46  ;;  %443 = vmatmul.f32.gmra.mxu0 %v2461_v38  ;;  %v2497_v38 = vld [vmem:[%s2100_s25 + $0xb8] sm:$0xff] }
  0x94   : > { %638 = vmatmul.f32.gmra.mxu3 %v2468_v10  ;;  %813 = vmatpush.xpose.msrb.mxu2 %v2476_v6  ;;  %v2494_v10 = vld [vmem:[%s2100_s25 + $0xb0] sm:$0xff]  ;;  %3520 = vst [vmem:[#allocation90_spill] sm:$0xff] %v2497_v38 }
  0x95   : > { %573 = vmatmul.f32.gmra.mxu2 %v2464_v29  ;;  %878 = vmatpush.xpose.msrb.mxu3 %v2480_v9  ;;  %v2491_v29 = vld [vmem:[%s2100_s25 + $0xa0] sm:$0xff]  ;;  %3519 = vst [vmem:[#allocation89_spill] sm:$0xff] %v2494_v10  ;;  %v2504_v6 = vld [vmem:[#allocation5 + $0x2d0] sm:$0xff]  ;;  %v2508_v9 = vld [vmem:[#allocation5 + $0x2d8] sm:$0xff] }
  0x96   : > { %508 = vmatmul.f32.gmra.mxu1 %v2471_v25  ;;  %683 = vmatpush.xpose.msrb.mxu0 %v2484_v34  ;;  %3518 = vst [vmem:[#allocation88_spill] sm:$0xff] %v2491_v29  ;;  %v2500_v25 = vld [vmem:[%s2100_s25 + $0xa8] sm:$0xff] }
  0x97   : > { %748 = vmatpush.xpose.msrb.mxu1 %v2486_v33  ;;  %3521 = vst [vmem:[#allocation91_spill] sm:$0xff] %v2500_v25 }
  0x98   : > { %3522 = vst [vmem:[#allocation92_spill] sm:$0xff] %v2504_v6  ;;  %814 = vmatpush.xpose.msrb.mxu2 %v2504_v6  ;;  %v2532_v6 = vld [vmem:[#allocation5 + $0x2b0] sm:$0xff] }
  0x99   : > { %3523 = vst [vmem:[#allocation93_spill] sm:$0xff] %v2508_v9  ;;  %879 = vmatpush.xpose.msrb.mxu3 %v2508_v9  ;;  %v2536_v9 = vld [vmem:[#allocation5 + $0x2b8] sm:$0xff] }
  0x9a   : > { %684 = vmatpush.xpose.msrb.mxu0 %v2512_v63  ;;  %3528 = vst [vmem:[#allocation98_spill] sm:$0xff] %v2532_v6 }
  0x9b   : > { %446 = vmatmul.f32.gmra.mxu0 %v2491_v29  ;;  %749 = vmatpush.xpose.msrb.mxu1 %v2514_v1  ;;  %v2525_v29 = vld [vmem:[%s2100_s25 + $0xd8] sm:$0xff]  ;;  %3529 = vst [vmem:[#allocation99_spill] sm:$0xff] %v2536_v9 }
  0x9c   : > { %641 = vmatmul.f32.gmra.mxu3 %v2497_v38  ;;  %v2522_v38 = vld [vmem:[%s2100_s25 + $0xd0] sm:$0xff]  ;;  %3526 = vst [vmem:[#allocation96_spill] sm:$0xff] %v2525_v29  ;;  %815 = vmatpush.xpose.msrb.mxu2 %v2532_v6 }
  0x9d   : > { %576 = vmatmul.f32.gmra.mxu2 %v2494_v10  ;;  %v2519_v10 = vld [vmem:[%s2100_s25 + $0xc0] sm:$0xff]  ;;  %3525 = vst [vmem:[#allocation95_spill] sm:$0xff] %v2522_v38  ;;  %880 = vmatpush.xpose.msrb.mxu3 %v2536_v9  ;;  %v2560_v6 = vld [vmem:[#allocation5 + $0x290] sm:$0xff]  ;;  %v2564_v9 = vld [vmem:[#allocation5 + $0x298] sm:$0xff] }
  0x9e   : > { %511 = vmatmul.f32.gmra.mxu1 %v2500_v25  ;;  %3524 = vst [vmem:[#allocation94_spill] sm:$0xff] %v2519_v10  ;;  %v2528_v25 = vld [vmem:[%s2100_s25 + $0xc8] sm:$0xff]  ;;  %685 = vmatpush.xpose.msrb.mxu0 %v2540_v54 }
  0x9f   : > { %3527 = vst [vmem:[#allocation97_spill] sm:$0xff] %v2528_v25  ;;  %750 = vmatpush.xpose.msrb.mxu1 %v2542_v2 }
  0xa0   : > { %3534 = vst [vmem:[#allocation104_spill] sm:$0xff] %v2560_v6  ;;  %816 = vmatpush.xpose.msrb.mxu2 %v2560_v6  ;;  %v2588_v6 = vld [vmem:[#allocation5 + $0x270] sm:$0xff] }
  0xa1   : > { %3535 = vst [vmem:[#allocation105_spill] sm:$0xff] %v2564_v9  ;;  %881 = vmatpush.xpose.msrb.mxu3 %v2564_v9  ;;  %v2592_v9 = vld [vmem:[#allocation5 + $0x278] sm:$0xff] }
  0xa2   : > { %686 = vmatpush.xpose.msrb.mxu0 %v2568_v60  ;;  %3540 = vst [vmem:[#allocation110_spill] sm:$0xff] %v2588_v6 }
  0xa3   : > { %449 = vmatmul.f32.gmra.mxu0 %v2519_v10  ;;  %v2553_v10 = vld [vmem:[%s2100_s25 + $0xf8] sm:$0xff]  ;;  %751 = vmatpush.xpose.msrb.mxu1 %v2570_v53  ;;  %3541 = vst [vmem:[#allocation111_spill] sm:$0xff] %v2592_v9 }
  0xa4   : > { %644 = vmatmul.f32.gmra.mxu3 %v2525_v29  ;;  %v2550_v29 = vld [vmem:[%s2100_s25 + $0xf0] sm:$0xff]  ;;  %3532 = vst [vmem:[#allocation102_spill] sm:$0xff] %v2553_v10  ;;  %817 = vmatpush.xpose.msrb.mxu2 %v2588_v6 }
  0xa5   : > { %579 = vmatmul.f32.gmra.mxu2 %v2522_v38  ;;  %v2547_v38 = vld [vmem:[%s2100_s25 + $0xe0] sm:$0xff]  ;;  %3531 = vst [vmem:[#allocation101_spill] sm:$0xff] %v2550_v29  ;;  %882 = vmatpush.xpose.msrb.mxu3 %v2592_v9  ;;  %v2616_v6 = vld [vmem:[#allocation5 + $0x250] sm:$0xff]  ;;  %v2620_v9 = vld [vmem:[#allocation5 + $0x258] sm:$0xff] }
  0xa6   : > { %514 = vmatmul.f32.gmra.mxu1 %v2528_v25  ;;  %3530 = vst [vmem:[#allocation100_spill] sm:$0xff] %v2547_v38  ;;  %v2556_v25 = vld [vmem:[%s2100_s25 + $0xe8] sm:$0xff]  ;;  %687 = vmatpush.xpose.msrb.mxu0 %v2596_v56 }
  0xa7   : > { %3533 = vst [vmem:[#allocation103_spill] sm:$0xff] %v2556_v25  ;;  %752 = vmatpush.xpose.msrb.mxu1 %v2598_v45 }
  0xa8   : > { %3546 = vst [vmem:[#allocation116_spill] sm:$0xff] %v2616_v6  ;;  %818 = vmatpush.xpose.msrb.mxu2 %v2616_v6  ;;  %v2644_v6 = vld [vmem:[#allocation5 + $0x230] sm:$0xff] }
  0xa9   : > { %3547 = vst [vmem:[#allocation117_spill] sm:$0xff] %v2620_v9  ;;  %883 = vmatpush.xpose.msrb.mxu3 %v2620_v9  ;;  %v2648_v9 = vld [vmem:[#allocation5 + $0x238] sm:$0xff] }
  0xaa   : > { %688 = vmatpush.xpose.msrb.mxu0 %v2624_v59  ;;  %3552 = vst [vmem:[#allocation122_spill] sm:$0xff] %v2644_v6 }
  0xab   : > { %452 = vmatmul.f32.gmra.mxu0 %v2547_v38  ;;  %v2581_v38 = vld [vmem:[%s2100_s25 + $0x118] sm:$0xff]  ;;  %753 = vmatpush.xpose.msrb.mxu1 %v2626_v49  ;;  %3553 = vst [vmem:[#allocation123_spill] sm:$0xff] %v2648_v9 }
  0xac   : > { %647 = vmatmul.f32.gmra.mxu3 %v2553_v10  ;;  %v2578_v10 = vld [vmem:[%s2100_s25 + $0x110] sm:$0xff]  ;;  %3538 = vst [vmem:[#allocation108_spill] sm:$0xff] %v2581_v38  ;;  %819 = vmatpush.xpose.msrb.mxu2 %v2644_v6  ;;  %v2668_v6 = vld [vmem:[%s2100_s25 + $0x168] sm:$0xff] }
  0xad   : > { %582 = vmatmul.f32.gmra.mxu2 %v2550_v29  ;;  %v2575_v29 = vld [vmem:[%s2100_s25 + $0x100] sm:$0xff]  ;;  %3537 = vst [vmem:[#allocation107_spill] sm:$0xff] %v2578_v10  ;;  %884 = vmatpush.xpose.msrb.mxu3 %v2648_v9  ;;  %v2676_v9 = vld [vmem:[#allocation5 + $0x218] sm:$0xff] }
  0xae   : > { %517 = vmatmul.f32.gmra.mxu1 %v2556_v25  ;;  %3536 = vst [vmem:[#allocation106_spill] sm:$0xff] %v2575_v29  ;;  %v2584_v25 = vld [vmem:[%s2100_s25 + $0x108] sm:$0xff]  ;;  %689 = vmatpush.xpose.msrb.mxu0 %v2652_v58  ;;  %v2680_v58 = vld [vmem:[#allocation5 + $0x200] sm:$0xff] }
  0xaf   : > { %3539 = vst [vmem:[#allocation109_spill] sm:$0xff] %v2584_v25  ;;  %754 = vmatpush.xpose.msrb.mxu1 %v2654_v57  ;;  %v2682_v57 = vld [vmem:[#allocation5 + $0x208] sm:$0xff] }
  0xb0   : > { %3559 = vst [vmem:[#allocation129_spill] sm:$0xff] %v2668_v6 }
  0xb1   : > { %885 = vmatpush.xpose.msrb.mxu3 %v2676_v9 }
  0xb2   : > { %690 = vmatpush.xpose.msrb.mxu0 %v2680_v58 }
  0xb3   : > { %455 = vmatmul.f32.gmra.mxu0 %v2575_v29  ;;  %v2609_v29 = vld [vmem:[%s2100_s25 + $0x138] sm:$0xff]  ;;  %755 = vmatpush.xpose.msrb.mxu1 %v2682_v57 }
  0xb4   : > { %650 = vmatmul.f32.gmra.mxu3 %v2581_v38  ;;  %v2606_v38 = vld [vmem:[%s2100_s25 + $0x130] sm:$0xff]  ;;  %3544 = vst [vmem:[#allocation114_spill] sm:$0xff] %v2609_v29 }
  0xb5   : > { %585 = vmatmul.f32.gmra.mxu2 %v2578_v10  ;;  %v2603_v10 = vld [vmem:[%s2100_s25 + $0x120] sm:$0xff]  ;;  %3543 = vst [vmem:[#allocation113_spill] sm:$0xff] %v2606_v38  ;;  %1162 = vmatpush.msra.mxu3 %v2326_v62  ;;  %v3588_v62 = vld [vmem:[#allocation20_spill] sm:$0xff] }
  0xb6   : > { %520 = vmatmul.f32.gmra.mxu1 %v2584_v25  ;;  %3542 = vst [vmem:[#allocation112_spill] sm:$0xff] %v2603_v10  ;;  %v2612_v25 = vld [vmem:[%s2100_s25 + $0x128] sm:$0xff]  ;;  %967 = vmatpush.msra.mxu0 %v2110_v0  ;;  %v2717_v0 = vld [vmem:[%s2100_s25 + $0x1a0] sm:$0xff] }
  0xb7   : > { %3545 = vst [vmem:[#allocation115_spill] sm:$0xff] %v2612_v25  ;;  %1032 = vmatpush.msra.mxu1 %v2315_v50  ;;  %1163 = vmatpush.msra.mxu3 %v2340_v37  ;;  %v3581_v50 = vld [vmem:[#allocation56_spill] sm:$0xff] }
  0xb8   : > { %968 = vmatpush.msra.mxu0 %v2121_v4  ;;  %v2725_v4 = vld [vmem:[%s2100_s25 + $0x1b8] sm:$0xff] }
  0xb9   : > { %1033 = vmatpush.msra.mxu1 %v2334_v41  ;;  %1164 = vmatpush.msra.mxu3 %v2366_v21  ;;  %v3563_v21 = vld [vmem:[#allocation45_spill] sm:$0xff]  ;;  %v3574_v41 = vld [vmem:[#allocation60_spill] sm:$0xff] }
  0xba   : > { %969 = vmatpush.msra.mxu0 %v2133_v8  ;;  %v2745_v8 = vld [vmem:[%s2100_s25 + $0x1c0] sm:$0xff] }
  0xbb   : > { %458 = vmatmul.f32.gmra.mxu0 %v2603_v10  ;;  %v2637_v10 = vld [vmem:[%s2100_s25 + $0x158] sm:$0xff]  ;;  %1034 = vmatpush.msra.mxu1 %v2355_v30 }
  0xbc   : > { %653 = vmatmul.f32.gmra.mxu3 %v2609_v29  ;;  %v2634_v29 = vld [vmem:[%s2100_s25 + $0x150] sm:$0xff]  ;;  %3550 = vst [vmem:[#allocation120_spill] sm:$0xff] %v2637_v10  ;;  %970 = vmatpush.msra.mxu0 %v2145_v12  ;;  %v2753_v12 = vld [vmem:[%s2100_s25 + $0x1d8] sm:$0xff] }
  0xbd   : > { %588 = vmatmul.f32.gmra.mxu2 %v2606_v38  ;;  %v2631_v38 = vld [vmem:[%s2100_s25 + $0x140] sm:$0xff]  ;;  %3549 = vst [vmem:[#allocation119_spill] sm:$0xff] %v2634_v29  ;;  %1165 = vmatpush.msra.mxu3 %v2380_v13  ;;  %v2758_v13 = vld [vmem:[%s2100_s25 + $0x1c8] sm:$0xff] }
  0xbe   : > { %523 = vmatmul.f32.gmra.mxu1 %v2612_v25  ;;  %3548 = vst [vmem:[#allocation118_spill] sm:$0xff] %v2631_v38  ;;  %v2640_v25 = vld [vmem:[%s2100_s25 + $0x148] sm:$0xff]  ;;  %971 = vmatpush.msra.mxu0 %v2157_v16 }
  0xbf   : > { %3551 = vst [vmem:[#allocation121_spill] sm:$0xff] %v2640_v25  ;;  %1035 = vmatpush.msra.mxu1 %v2374_v17  ;;  %1166 = vmatpush.msra.mxu3 %v2406_v61  ;;  %v2786_v16 = vld [vmem:[%s2100_s25 + $0x1e8] sm:$0xff]  ;;  %v3560_v17 = vld [vmem:[#allocation52_spill] sm:$0xff] }
  0xc0   : > { %972 = vmatpush.msra.mxu0 %v2169_v20  ;;  %v3562_v20 = vld [vmem:[#allocation54_spill] sm:$0xff] }
  0xc1   : > { %1036 = vmatpush.msra.mxu1 %v2395_v26  ;;  %1167 = vmatpush.msra.mxu3 %v2420_v42  ;;  %v3566_v26 = vld [vmem:[#allocation42_spill] sm:$0xff]  ;;  %v3575_v42 = vld [vmem:[#allocation61_spill] sm:$0xff] }
  0xc2   : > { %973 = vmatpush.msra.mxu0 %v2181_v24 }
  0xc3   : > { %461 = vmatmul.f32.gmra.mxu0 %v2631_v38  ;;  %v2662_v38 = vld [vmem:[%s2100_s25 + $0x170] sm:$0xff]  ;;  %1037 = vmatpush.msra.mxu1 %v2414_v14 }
  0xc4   : > { %656 = vmatmul.f32.gmra.mxu3 %v2637_v10  ;;  %3557 = vst [vmem:[#allocation127_spill] sm:$0xff] %v2662_v38  ;;  %v2665_v10 = vld [vmem:[%s2100_s25 + $0x178] sm:$0xff]  ;;  %974 = vmatpush.msra.mxu0 %v2193_v28  ;;  %v2776_v14 = vld [vmem:[%s2100_s25 + $0x1f0] sm:$0xff] }
  0xc5   : > { %591 = vmatmul.f32.gmra.mxu2 %v2634_v29  ;;  %v2659_v29 = vld [vmem:[%s2100_s25 + $0x160] sm:$0xff]  ;;  %3558 = vst [vmem:[#allocation128_spill] sm:$0xff] %v2665_v10  ;;  %1168 = vmatpush.msra.mxu3 %v2444_v18  ;;  %v3561_v18 = vld [vmem:[#allocation53_spill] sm:$0xff] }
  0xc6   : > { %526 = vmatmul.f32.gmra.mxu1 %v2640_v25  ;;  %3556 = vst [vmem:[#allocation126_spill] sm:$0xff] %v2659_v29  ;;  %v2672_v25 = vld [vmem:[#allocation5 + $0x210] sm:$0xff]  ;;  %975 = vmatpush.msra.mxu0 %v2205_v32 }
  0xc7   : > { %820 = vmatpush.xpose.msrb.mxu2 %v2672_v25  ;;  %1038 = vmatpush.msra.mxu1 %v2435_v22  ;;  %v3564_v22 = vld [vmem:[#allocation55_spill] sm:$0xff] }
  0xc8   : > { %1169 = vmatpush.msra.mxu3 %v2458_v46  ;;  %976 = vmatpush.msra.mxu0 %v2217_v36  ;;  %v3571_v36 = vld [vmem:[#allocation51_spill] sm:$0xff] }
  0xc9   : > { %1039 = vmatpush.msra.mxu1 %v2454_v5  ;;  %v2773_v5 = vld [vmem:[%s2100_s25 + $0x1e0] sm:$0xff]  ;;  %v3578_v46 = vld [vmem:[#allocation63_spill] sm:$0xff] }
  0xca   : > { %1170 = vmatpush.msra.mxu3 %v2486_v33  ;;  %977 = vmatpush.msra.mxu0 %v2229_v40  ;;  %v3569_v33 = vld [vmem:[#allocation46_spill] sm:$0xff]  ;;  %v3573_v40 = vld [vmem:[#allocation49_spill] sm:$0xff] }
  0xcb   : > { %464 = vmatmul.f32.gmra.mxu0 %v2659_v29  ;;  %1097 = vmatpush.msra.mxu2 %v2118_v3  ;;  %v2702_v29 = vld [vmem:[%s2100_s25 + $0x188] sm:$0xff]  ;;  %v2720_v3 = vld [vmem:[%s2100_s25 + $0x1b0] sm:$0xff] }
  0xcc   : > { %659 = vmatmul.f32.gmra.mxu3 %v2665_v10  ;;  %v2689_v10 = vld [vmem:[%s2100_s25 + $0x180] sm:$0xff]  ;;  %1040 = vmatpush.msra.mxu1 %v2484_v34 }
  0xcd   : > { %594 = vmatmul.f32.gmra.mxu2 %v2662_v38  ;;  %v2692_v38 = vld [vmem:[%s2100_s25 + $0x190] sm:$0xff]  ;;  %1171 = vmatpush.msra.mxu3 %v2514_v1 }
  0xce   : > { %529 = vmatmul.f32.gmra.mxu1 %v2668_v6  ;;  %v2697_v6 = vld [vmem:[%s2100_s25 + $0x198] sm:$0xff]  ;;  %1098 = vmatpush.msra.mxu2 %v2128_v7  ;;  %v2730_v7 = vld [vmem:[%s2100_s25 + $0x1a8] sm:$0xff] }
  0xcf   : > { %1041 = vmatpush.msra.mxu1 %v2512_v63  ;;  %1172 = vmatpush.msra.mxu3 %v2542_v2  ;;  %v3589_v63 = vld [vmem:[#allocation64_spill] sm:$0xff] }
  0xd0   : > { %1099 = vmatpush.msra.mxu2 %v2140_v11  ;;  %v2748_v11 = vld [vmem:[%s2100_s25 + $0x1d0] sm:$0xff]  ;;  %978 = vmatpush.msra.mxu0 %v2241_v44  ;;  %v3576_v44 = vld [vmem:[#allocation62_spill] sm:$0xff] }
  0xd1   : > { %1042 = vmatpush.msra.mxu1 %v2540_v54  ;;  %1173 = vmatpush.msra.mxu3 %v2570_v53  ;;  %v3582_v53 = vld [vmem:[#allocation19_spill] sm:$0xff] }
  0xd2   : > { %1100 = vmatpush.msra.mxu2 %v2152_v15  ;;  %v2781_v15 = vld [vmem:[%s2100_s25 + $0x1f8] sm:$0xff]  ;;  %979 = vmatpush.msra.mxu0 %v2253_v48  ;;  %v3583_v54 = vld [vmem:[#allocation59_spill] sm:$0xff] }
  0xd3   : > { %467 = vmatmul.f32.gmra.mxu0 %v2689_v10  ;;  %1043 = vmatpush.msra.mxu1 %v2568_v60  ;;  %v3587_v60 = vld [vmem:[#allocation65_spill] sm:$0xff] }
  0xd4   : > { %662 = vmatmul.f32.gmra.mxu3 %v2697_v6  ;;  %1101 = vmatpush.msra.mxu2 %v2164_v19 }
  0xd5   : > { %597 = vmatmul.f32.gmra.mxu2 %v2692_v38  ;;  %1174 = vmatpush.msra.mxu3 %v2598_v45  ;;  %v3577_v45 = vld [vmem:[#allocation17_spill] sm:$0xff] }
  0xd6   : > { %532 = vmatmul.f32.gmra.mxu1 %v2702_v29  ;;  %1102 = vmatpush.msra.mxu2 %v2176_v23  ;;  %v3565_v23 = vld [vmem:[#allocation125_spill] sm:$0xff] }
  0xd7   : > { %1044 = vmatpush.msra.mxu1 %v2596_v56  ;;  %1175 = vmatpush.msra.mxu3 %v2626_v49  ;;  %v3580_v49 = vld [vmem:[#allocation16_spill] sm:$0xff]  ;;  %v3584_v56 = vld [vmem:[#allocation18_spill] sm:$0xff] }
  0xd8   : > { %1103 = vmatpush.msra.mxu2 %v2188_v27  ;;  %980 = vmatpush.msra.mxu0 %v2265_v52  ;;  %v3567_v27 = vld [vmem:[#allocation124_spill] sm:$0xff] }
  0xd9   : > { %1045 = vmatpush.msra.mxu1 %v2624_v59  ;;  %1176 = vmatpush.msra.mxu3 %v3565_v23  ;;  %v3586_v59 = vld [vmem:[#allocation21_spill] sm:$0xff]  ;;  %v3596_v23 = vld [vmem:[#allocation22_spill] sm:$0xff] }
  0xda   : > { %1104 = vmatpush.msra.mxu2 %v2200_v31  ;;  %981 = vmatpush.msra.mxu0 %v3566_v26  ;;  %v3568_v31 = vld [vmem:[#allocation50_spill] sm:$0xff] }
  0xdb   : > { %470 = vmatmul.f32.gmra.mxu0 %v2717_v0  ;;  %1046 = vmatpush.msra.mxu1 %v3567_v27 }
  0xdc   : > { %665 = vmatmul.f32.gmra.mxu3 %v2725_v4  ;;  %1105 = vmatpush.msra.mxu2 %v2212_v35  ;;  %v3570_v35 = vld [vmem:[#allocation15_spill] sm:$0xff] }
  0xdd   : > { %600 = vmatmul.f32.gmra.mxu2 %v2720_v3  ;;  %1177 = vmatpush.msra.mxu3 %v2682_v57  ;;  %v3585_v57 = vld [vmem:[#allocation58_spill] sm:$0xff] }
  0xde   : > { %535 = vmatmul.f32.gmra.mxu1 %v2730_v7  ;;  %1106 = vmatpush.msra.mxu2 %v2224_v39  ;;  %v3572_v39 = vld [vmem:[#allocation14_spill] sm:$0xff] }
  0xdf   : > { %982 = vmatpush.msra.mxu0 %v3569_v33  ;;  %1047 = vmatpush.msra.mxu1 %v2680_v58  ;;  %v3601_v33 = vld [vmem:[#allocation72_spill] sm:$0xff] }
  0xe0   : > { %1107 = vmatpush.msra.mxu2 %v2236_v43 }
  0xe2   : > { %1108 = vmatpush.msra.mxu2 %v2248_v47  ;;  %v3579_v47 = vld [vmem:[#allocation57_spill] sm:$0xff] }
  0xe3   : > { %473 = vmatmul.f32.gmra.mxu0 %v2745_v8 }
  0xe4   : > { %668 = vmatmul.f32.gmra.mxu3 %v2753_v12  ;;  %1109 = vmatpush.msra.mxu2 %v2260_v51 }
  0xe5   : > { %603 = vmatmul.f32.gmra.mxu2 %v2748_v11 }
  0xe6   : > { %538 = vmatmul.f32.gmra.mxu1 %v2758_v13  ;;  %1110 = vmatpush.msra.mxu2 %v2272_v55 }
  0xe8   : > { %1111 = vmatpush.msra.mxu2 %v3563_v21  ;;  %v3595_v21 = vld [vmem:[#allocation67_spill] sm:$0xff] }
  0xea   : > { %1112 = vmatpush.msra.mxu2 %v3568_v31 }
  0xeb   : > { %476 = vmatmul.f32.gmra.mxu0 %v2773_v5 }
  0xec   : > { %671 = vmatmul.f32.gmra.mxu3 %v2781_v15 }
  0xed   : > { %606 = vmatmul.f32.gmra.mxu2 %v2776_v14 }
  0xee   : > { %541 = vmatmul.f32.gmra.mxu1 %v2786_v16 }
  0xf0   : > { %v432_v1 = vpop.f32.mrf.mxu0 }
  0xf3   : > { %v497_v2 = vpop.f32.mrf.mxu1  ;;  %691 = vmatmul.f32.vlgmr.msrb.gmra.mxu0 %v3560_v17 }
  0xf4   : > { %v498_v19 = vadd.f32 %v497_v2, %v432_v1  ;;  %886 = vmatmul.f32.vlgmr.msrb.gmra.mxu3 %v3562_v20  ;;  %1227 = vmatpush.msrb.mxu0 %v3572_v39  ;;  %v3590_v1 = vld [vmem:[#allocation68_spill] sm:$0xff]  ;;  %v3591_v2 = vld [vmem:[#allocation69_spill] sm:$0xff]  ;;  %v3594_v20 = vld [vmem:[#allocation71_spill] sm:$0xff] }
  0xf5   : > { %821 = vmatmul.f32.vlgmr.msrb.gmra.mxu2 %v3561_v18  ;;  %1422 = vmatpush.msrb.mxu3 %v3571_v36  ;;  %v3592_v18 = vld [vmem:[#allocation70_spill] sm:$0xff]  ;;  %v3602_v36 = vld [vmem:[#allocation27_spill] sm:$0xff] }
  0xf6   : > { %756 = vmatmul.f32.vlgmr.msrb.gmra.mxu1 %v3564_v22  ;;  %v562_v24 = vpop.f32.mrf.mxu2  ;;  %1357 = vmatpush.msrb.mxu2 %v3570_v35 }
  0xf7   : > { %v563_v28 = vadd.f32 %v562_v24, %v498_v19  ;;  %v627_v30 = vpop.f32.mrf.mxu3  ;;  %1292 = vmatpush.msrb.mxu1 %v3573_v40  ;;  %1423 = vmatpush.msrb.mxu3 %v3579_v47  ;;  %v3593_v19 = vld [vmem:[#allocation23_spill] sm:$0xff]  ;;  %v3597_v24 = vld [vmem:[#allocation66_spill] sm:$0xff] }
  0xf8   : > { %v435_v32 = vpop.f32.mrf.mxu0  ;;  %1358 = vmatpush.msrb.mxu2 %v3577_v45  ;;  %1228 = vmatpush.msrb.mxu0 %v3580_v49  ;;  %v3604_v40 = vld [vmem:[#allocation26_spill] sm:$0xff]  ;;  %v3610_v47 = vld [vmem:[#allocation79_spill] sm:$0xff] }
  0xf9   : > { %v2819_v34 = vadd.f32 %v627_v30, %v563_v28  ;;  %1293 = vmatpush.msrb.mxu1 %v3581_v50  ;;  %1424 = vmatpush.msrb.mxu3 %v3583_v54  ;;  %v3598_v28 = vld [vmem:[#allocation25_spill] sm:$0xff]  ;;  %v3608_v45 = vld [vmem:[#allocation78_spill] sm:$0xff]  ;;  %v3612_v50 = vld [vmem:[#allocation28_spill] sm:$0xff] }
  0xfa   : > { %1359 = vmatpush.msrb.mxu2 %v3582_v53  ;;  %1229 = vmatpush.msrb.mxu0 %v3584_v56  ;;  %v3599_v30 = vld [vmem:[#allocation73_spill] sm:$0xff]  ;;  %v3614_v54 = vld [vmem:[#allocation31_spill] sm:$0xff] }
  0xfb   : > { %v500_v37 = vpop.f32.mrf.mxu1  ;;  %935 = vst [vmem:[%s2825_s23] sm:$0xff] %v2819_v34  ;;  %694 = vmatmul.f32.gmra.mxu0 %v3574_v41  ;;  %1294 = vmatpush.msrb.mxu1 %v3585_v57  ;;  %v3605_v41 = vld [vmem:[#allocation74_spill] sm:$0xff] }
  0xfc   : > { %v501_v43 = vadd.f32 %v500_v37, %v435_v32  ;;  %889 = vmatmul.f32.gmra.mxu3 %v3576_v44  ;;  %1360 = vmatpush.msrb.mxu2 %v3586_v59  ;;  %v3600_v32 = vld [vmem:[#allocation24_spill] sm:$0xff]  ;;  %v3603_v37 = vld [vmem:[#allocation75_spill] sm:$0xff]  ;;  %v3616_v57 = vld [vmem:[#allocation30_spill] sm:$0xff] }
  0xfd   : > { %824 = vmatmul.f32.gmra.mxu2 %v3575_v42  ;;  %1425 = vmatpush.msrb.mxu3 %v3587_v60  ;;  %v3606_v42 = vld [vmem:[#allocation76_spill] sm:$0xff]  ;;  %v3617_v59 = vld [vmem:[#allocation86_spill] sm:$0xff] }
  0xfe   : > { %759 = vmatmul.f32.gmra.mxu1 %v3578_v46  ;;  %1230 = vmatpush.msrb.mxu0 %v3588_v62  ;;  %v3609_v46 = vld [vmem:[#allocation29_spill] sm:$0xff] }
  0xff   : > { %v630_v52 = vpop.f32.mrf.mxu3  ;;  %1295 = vmatpush.msrb.mxu1 %v3589_v63  ;;  %1361 = vmatpush.msrb.mxu2 %v3593_v19  ;;  %v3619_v62 = vld [vmem:[#allocation93_spill] sm:$0xff] }
 0x100   : > { %v565_v48 = vpop.f32.mrf.mxu2  ;;  %v438_v55 = vpop.f32.mrf.mxu0  ;;  %1426 = vmatpush.msrb.mxu3 %v3595_v21  ;;  %1231 = vmatpush.msrb.mxu0 %v3596_v23  ;;  %v3625_v21 = vld [vmem:[#allocation35_spill] sm:$0xff] }
 0x101   : > { %v566_v51 = vadd.f32 %v565_v48, %v501_v43  ;;  %1296 = vmatpush.msrb.mxu1 %v3597_v24  ;;  %1362 = vmatpush.msrb.mxu2 %v3598_v28  ;;  %v3607_v43 = vld [vmem:[#allocation77_spill] sm:$0xff]  ;;  %v3627_v23 = vld [vmem:[#allocation99_spill] sm:$0xff] }
 0x102   : > { %1427 = vmatpush.msrb.mxu3 %v3599_v30  ;;  %1232 = vmatpush.msrb.mxu0 %v3600_v32  ;;  %v3611_v48 = vld [vmem:[#allocation81_spill] sm:$0xff] }
 0x103   : > { %v2841_v58 = vadd.f32 %v630_v52, %v566_v51  ;;  %v503_v61 = vpop.f32.mrf.mxu1  ;;  %697 = vmatmul.f32.gmra.mxu0 %v3590_v1  ;;  %1297 = vmatpush.msrb.mxu1 %v3601_v33  ;;  %v3613_v51 = vld [vmem:[#allocation80_spill] sm:$0xff]  ;;  %v3631_v32 = vld [vmem:[#allocation105_spill] sm:$0xff] }
 0x104   : > { %v504_v17 = vadd.f32 %v503_v61, %v438_v55  ;;  %892 = vmatmul.f32.gmra.mxu3 %v3592_v18  ;;  %1363 = vmatpush.msrb.mxu2 %v3602_v36  ;;  %v3615_v55 = vld [vmem:[#allocation87_spill] sm:$0xff]  ;;  %v3618_v61 = vld [vmem:[#allocation33_spill] sm:$0xff]  ;;  %v3620_v1 = vld [vmem:[#allocation32_spill] sm:$0xff] }
 0x105   : > { %937 = vst [vmem:[%s2825_s23 + $0x10] sm:$0xff] %v2841_v58  ;;  %827 = vmatmul.f32.gmra.mxu2 %v3591_v2  ;;  %1428 = vmatpush.msrb.mxu3 %v3603_v37  ;;  %v3621_v2 = vld [vmem:[#allocation92_spill] sm:$0xff]  ;;  %v3623_v18 = vld [vmem:[#allocation83_spill] sm:$0xff] }
 0x106   : > { %762 = vmatmul.f32.gmra.mxu1 %v3594_v20  ;;  %1233 = vmatpush.msrb.mxu0 %v3604_v40  ;;  %v3624_v20 = vld [vmem:[#allocation84_spill] sm:$0xff]  ;;  %v3634_v40 = vld [vmem:[#allocation39_spill] sm:$0xff] }
 0x107   : > { %v633_v27 = vpop.f32.mrf.mxu3  ;;  %1298 = vmatpush.msrb.mxu1 %v3605_v41  ;;  %1364 = vmatpush.msrb.mxu2 %v3609_v46  ;;  %v3632_v36 = vld [vmem:[#allocation36_spill] sm:$0xff]  ;;  %v3635_v41 = vld [vmem:[#allocation111_spill] sm:$0xff]  ;;  %v3639_v46 = vld [vmem:[#allocation89_spill] sm:$0xff] }
 0x108   : > { %v568_v22 = vpop.f32.mrf.mxu2  ;;  %v441_v31 = vpop.f32.mrf.mxu0  ;;  %1429 = vmatpush.msrb.mxu3 %v3611_v48  ;;  %1234 = vmatpush.msrb.mxu0 %v3612_v50  ;;  %v3633_v37 = vld [vmem:[#allocation104_spill] sm:$0xff]  ;;  %v3640_v48 = vld [vmem:[#allocation90_spill] sm:$0xff]  ;;  %v3642_v50 = vld [vmem:[#allocation91_spill] sm:$0xff] }
 0x109   : > { %v569_v26 = vadd.f32 %v568_v22, %v504_v17  ;;  %1299 = vmatpush.msrb.mxu1 %v3613_v51  ;;  %1365 = vmatpush.msrb.mxu2 %v3614_v54  ;;  %v3622_v17 = vld [vmem:[#allocation82_spill] sm:$0xff]  ;;  %v3626_v22 = vld [vmem:[#allocation85_spill] sm:$0xff]  ;;  %v3645_v54 = vld [vmem:[#allocation116_spill] sm:$0xff] }
 0x10a   : > { %1430 = vmatpush.msrb.mxu3 %v3615_v55  ;;  %1235 = vmatpush.msrb.mxu0 %v3616_v57  ;;  %v3643_v51 = vld [vmem:[#allocation117_spill] sm:$0xff]  ;;  %v3646_v57 = vld [vmem:[#allocation44_spill] sm:$0xff] }
 0x10b   : > { %v2861_v35 = vadd.f32 %v633_v27, %v569_v26  ;;  %v506_v39 = vpop.f32.mrf.mxu1  ;;  %700 = vmatmul.f32.gmra.mxu0 %v3606_v42  ;;  %1300 = vmatpush.msrb.mxu1 %v3617_v59  ;;  %v3628_v26 = vld [vmem:[#allocation34_spill] sm:$0xff]  ;;  %v3647_v59 = vld [vmem:[#allocation123_spill] sm:$0xff] }
 0x10c   : > { %v507_v44 = vadd.f32 %v506_v39, %v441_v31  ;;  %895 = vmatmul.f32.gmra.mxu3 %v3608_v45  ;;  %1366 = vmatpush.msrb.mxu2 %v3618_v61  ;;  %v3629_v27 = vld [vmem:[#allocation98_spill] sm:$0xff]  ;;  %v3630_v31 = vld [vmem:[#allocation37_spill] sm:$0xff]  ;;  %v3638_v45 = vld [vmem:[#allocation88_spill] sm:$0xff] }
 0x10d   : > { %939 = vst [vmem:[%s2825_s23 + $0x20] sm:$0xff] %v2861_v35  ;;  %830 = vmatmul.f32.gmra.mxu2 %v3607_v43  ;;  %1431 = vmatpush.msrb.mxu3 %v3619_v62  ;;  %v3636_v43 = vld [vmem:[#allocation38_spill] sm:$0xff]  ;;  %v3648_v62 = vld [vmem:[#allocation43_spill] sm:$0xff] }
 0x10e   : > { %765 = vmatmul.f32.gmra.mxu1 %v3610_v47  ;;  %1236 = vmatpush.msrb.mxu0 %v3620_v1 }
 0x10f   : > { %v636_v53 = vpop.f32.mrf.mxu3  ;;  %1301 = vmatpush.msrb.mxu1 %v3621_v2  ;;  %1367 = vmatpush.msrb.mxu2 %v3625_v21  ;;  %v3650_v2 = vld [vmem:[#allocation48_spill] sm:$0xff] }
 0x110   : > { %v571_v49 = vpop.f32.mrf.mxu2  ;;  %v444_v56 = vpop.f32.mrf.mxu0  ;;  %1432 = vmatpush.msrb.mxu3 %v3627_v23  ;;  %1237 = vmatpush.msrb.mxu0 %v3628_v26  ;;  %v3655_v23 = vld [vmem:[#allocation97_spill] sm:$0xff] }
 0x111   : > { %v572_v52 = vadd.f32 %v571_v49, %v507_v44  ;;  %1302 = vmatpush.msrb.mxu1 %v3629_v27  ;;  %1368 = vmatpush.msrb.mxu2 %v3630_v31  ;;  %v3637_v44 = vld [vmem:[#allocation110_spill] sm:$0xff]  ;;  %v3641_v49 = vld [vmem:[#allocation41_spill] sm:$0xff] }
 0x112   : > { %1433 = vmatpush.msrb.mxu3 %v3631_v32  ;;  %1238 = vmatpush.msrb.mxu0 %v3632_v36  ;;  %v3657_v31 = vld [vmem:[#allocation101_spill] sm:$0xff]  ;;  %v3659_v36 = vld [vmem:[#allocation103_spill] sm:$0xff] }
 0x113   : > { %v2881_v60 = vadd.f32 %v636_v53, %v572_v52  ;;  %v509_v63 = vpop.f32.mrf.mxu1  ;;  %703 = vmatmul.f32.gmra.mxu0 %v3622_v17  ;;  %1303 = vmatpush.msrb.mxu1 %v3633_v37  ;;  %v3644_v53 = vld [vmem:[#allocation40_spill] sm:$0xff] }
 0x114   : > { %v510_v19 = vadd.f32 %v509_v63, %v444_v56  ;;  %898 = vmatmul.f32.gmra.mxu3 %v3624_v20  ;;  %1369 = vmatpush.msrb.mxu2 %v3634_v40  ;;  %v3649_v63 = vld [vmem:[#allocation122_spill] sm:$0xff]  ;;  %v3653_v20 = vld [vmem:[#allocation95_spill] sm:$0xff] }
 0x115   : > { %941 = vst [vmem:[%s2825_s23 + $0x30] sm:$0xff] %v2881_v60  ;;  %833 = vmatmul.f32.gmra.mxu2 %v3623_v18  ;;  %1434 = vmatpush.msrb.mxu3 %v3635_v41  ;;  %v3651_v18 = vld [vmem:[#allocation47_spill] sm:$0xff] }
 0x116   : > { %768 = vmatmul.f32.gmra.mxu1 %v3626_v22  ;;  %1239 = vmatpush.msrb.mxu0 %v3636_v43  ;;  %v3654_v22 = vld [vmem:[#allocation96_spill] sm:$0xff] }
 0x117   : > { %v639_v30 = vpop.f32.mrf.mxu3  ;;  %1304 = vmatpush.msrb.mxu1 %v3637_v44  ;;  %1370 = vmatpush.msrb.mxu2 %v3641_v49  ;;  %v3663_v49 = vld [vmem:[#allocation109_spill] sm:$0xff] }
 0x118   : > { %v574_v24 = vpop.f32.mrf.mxu2  ;;  %v447_v33 = vpop.f32.mrf.mxu0  ;;  %1435 = vmatpush.msrb.mxu3 %v3643_v51  ;;  %1240 = vmatpush.msrb.mxu0 %v3644_v53 }
 0x119   : > { %v575_v28 = vadd.f32 %v574_v24, %v510_v19  ;;  %1305 = vmatpush.msrb.mxu1 %v3645_v54  ;;  %1371 = vmatpush.msrb.mxu2 %v3646_v57  ;;  %v3652_v19 = vld [vmem:[#allocation94_spill] sm:$0xff]  ;;  %v3665_v57 = vld [vmem:[#allocation113_spill] sm:$0xff] }
 0x11a   : > { %1436 = vmatpush.msrb.mxu3 %v3647_v59  ;;  %1241 = vmatpush.msrb.mxu0 %v3648_v62  ;;  %v3667_v62 = vld [vmem:[#allocation115_spill] sm:$0xff] }
 0x11b   : > { %v2901_v39 = vadd.f32 %v639_v30, %v575_v28  ;;  %v512_v42 = vpop.f32.mrf.mxu1  ;;  %706 = vmatmul.f32.gmra.mxu0 %v3638_v45  ;;  %1306 = vmatpush.msrb.mxu1 %v3649_v63  ;;  %v3660_v45 = vld [vmem:[#allocation106_spill] sm:$0xff] }
 0x11c   : > { %v513_v47 = vadd.f32 %v512_v42, %v447_v33  ;;  %901 = vmatmul.f32.gmra.mxu3 %v3640_v48  ;;  %1372 = vmatpush.msrb.mxu2 %v3650_v2  ;;  %v3658_v33 = vld [vmem:[#allocation102_spill] sm:$0xff]  ;;  %v3662_v48 = vld [vmem:[#allocation108_spill] sm:$0xff] }
 0x11d   : > { %943 = vst [vmem:[%s2825_s23 + $0x40] sm:$0xff] %v2901_v39  ;;  %836 = vmatmul.f32.gmra.mxu2 %v3639_v46  ;;  %1437 = vmatpush.msrb.mxu3 %v2676_v9  ;;  %v3661_v46 = vld [vmem:[#allocation107_spill] sm:$0xff] }
 0x11e   : > { %771 = vmatmul.f32.gmra.mxu1 %v3642_v50  ;;  %1242 = vmatpush.msrb.mxu0 %v3651_v18 }
 0x11f   : > { %v642_v56 = vpop.f32.mrf.mxu3  ;;  %1307 = vmatpush.msrb.mxu1 %v2672_v25  ;;  %v3656_v25 = vld [vmem:[#allocation100_spill] sm:$0xff] }
 0x120   : > { %v577_v52 = vpop.f32.mrf.mxu2  ;;  %v450_v61 = vpop.f32.mrf.mxu0 }
 0x121   : > { %v578_v55 = vadd.f32 %v577_v52, %v513_v47 }
 0x123   : > { %v2921_v1 = vadd.f32 %v642_v56, %v578_v55  ;;  %v515_v17 = vpop.f32.mrf.mxu1  ;;  %709 = vmatmul.f32.gmra.mxu0 %v3652_v19  ;;  %v3664_v56 = vld [vmem:[#allocation112_spill] sm:$0xff] }
 0x124   : > { %v516_v21 = vadd.f32 %v515_v17, %v450_v61  ;;  %904 = vmatmul.f32.gmra.mxu3 %v3654_v22  ;;  %v3666_v61 = vld [vmem:[#allocation114_spill] sm:$0xff]  ;;  %v3669_v22 = vld [vmem:[#allocation119_spill] sm:$0xff] }
 0x125   : > { %945 = vst [vmem:[%s2825_s23 + $0x50] sm:$0xff] %v2921_v1  ;;  %839 = vmatmul.f32.gmra.mxu2 %v3653_v20 }
 0x126   : > { %774 = vmatmul.f32.gmra.mxu1 %v3655_v23 }
 0x127   : > { %v645_v9 = vpop.f32.mrf.mxu3 }
 0x128   : > { %v580_v24 = vpop.f32.mrf.mxu2  ;;  %v453_v27 = vpop.f32.mrf.mxu0 }
 0x129   : > { %v581_v26 = vadd.f32 %v580_v24, %v516_v21  ;;  %v3668_v21 = vld [vmem:[#allocation118_spill] sm:$0xff]  ;;  %v3670_v24 = vld [vmem:[#allocation120_spill] sm:$0xff] }
 0x12b   : > { %v2933_v28 = vadd.f32 %v645_v9, %v581_v26  ;;  %v518_v30 = vpop.f32.mrf.mxu1  ;;  %712 = vmatmul.f32.gmra.mxu0 %v3656_v25  ;;  %v3671_v26 = vld [vmem:[#allocation121_spill] sm:$0xff] }
 0x12c   : > { %v519_v32 = vadd.f32 %v518_v30, %v453_v27  ;;  %907 = vmatmul.f32.gmra.mxu3 %v3658_v33  ;;  %v3672_v33 = vld [vmem:[#allocation126_spill] sm:$0xff] }
 0x12d   : > { %947 = vst [vmem:[%s2825_s23 + $0x60] sm:$0xff] %v2933_v28  ;;  %842 = vmatmul.f32.gmra.mxu2 %v3657_v31 }
 0x12e   : > { %777 = vmatmul.f32.gmra.mxu1 %v3659_v36  ;;  %v3673_v36 = vld [vmem:[#allocation127_spill] sm:$0xff] }
 0x12f   : > { %v648_v41 = vpop.f32.mrf.mxu3 }
 0x130   : > { %v583_v37 = vpop.f32.mrf.mxu2  ;;  %v456_v42 = vpop.f32.mrf.mxu0 }
 0x131   : > { %v584_v40 = vadd.f32 %v583_v37, %v519_v32 }
 0x133   : > { %v2941_v43 = vadd.f32 %v648_v41, %v584_v40  ;;  %v521_v44 = vpop.f32.mrf.mxu1  ;;  %715 = vmatmul.f32.gmra.mxu0 %v3660_v45  ;;  %v3674_v40 = vld [vmem:[#allocation128_spill] sm:$0xff]  ;;  %v3675_v41 = vld [vmem:[#allocation129_spill] sm:$0xff] }
 0x134   : > { %v522_v47 = vadd.f32 %v521_v44, %v456_v42  ;;  %910 = vmatmul.f32.gmra.mxu3 %v3662_v48 }
 0x135   : > { %949 = vst [vmem:[%s2825_s23 + $0x70] sm:$0xff] %v2941_v43  ;;  %845 = vmatmul.f32.gmra.mxu2 %v3661_v46 }
 0x136   : > { %780 = vmatmul.f32.gmra.mxu1 %v3663_v49 }
 0x137   : > { %v651_v52 = vpop.f32.mrf.mxu3 }
 0x138   : > { %v586_v50 = vpop.f32.mrf.mxu2  ;;  %v459_v53 = vpop.f32.mrf.mxu0 }
 0x139   : > { %v587_v51 = vadd.f32 %v586_v50, %v522_v47 }
 0x13b   : > { %v2949_v54 = vadd.f32 %v651_v52, %v587_v51  ;;  %v524_v55 = vpop.f32.mrf.mxu1  ;;  %718 = vmatmul.f32.gmra.mxu0 %v3664_v56 }
 0x13c   : > { %v525_v59 = vadd.f32 %v524_v55, %v459_v53  ;;  %913 = vmatmul.f32.gmra.mxu3 %v3666_v61 }
 0x13d   : > { %951 = vst [vmem:[%s2825_s23 + $0x80] sm:$0xff] %v2949_v54  ;;  %848 = vmatmul.f32.gmra.mxu2 %v3665_v57 }
 0x13e   : > { %783 = vmatmul.f32.gmra.mxu1 %v3667_v62 }
 0x13f   : > { %v654_v17 = vpop.f32.mrf.mxu3 }
 0x140   : > { %v589_v63 = vpop.f32.mrf.mxu2  ;;  %v462_v18 = vpop.f32.mrf.mxu0 }
 0x141   : > { %v590_v2 = vadd.f32 %v589_v63, %v525_v59 }
 0x143   : > { %v2957_v19 = vadd.f32 %v654_v17, %v590_v2  ;;  %v527_v20 = vpop.f32.mrf.mxu1  ;;  %721 = vmatmul.f32.gmra.mxu0 %v3668_v21 }
 0x144   : > { %v528_v23 = vadd.f32 %v527_v20, %v462_v18  ;;  %916 = vmatmul.f32.gmra.mxu3 %v3670_v24 }
 0x145   : > { %953 = vst [vmem:[%s2825_s23 + $0x90] sm:$0xff] %v2957_v19  ;;  %851 = vmatmul.f32.gmra.mxu2 %v3669_v22 }
 0x146   : > { %786 = vmatmul.f32.gmra.mxu1 %v3671_v26 }
 0x147   : > { %v657_v30 = vpop.f32.mrf.mxu3 }
 0x148   : > { %v592_v9 = vpop.f32.mrf.mxu2  ;;  %v465_v25 = vpop.f32.mrf.mxu0 }
 0x149   : > { %v593_v27 = vadd.f32 %v592_v9, %v528_v23 }
 0x14b   : > { %v2965_v31 = vadd.f32 %v657_v30, %v593_v27  ;;  %v530_v32 = vpop.f32.mrf.mxu1  ;;  %724 = vmatmul.f32.gmra.mxu0 %v3672_v33 }
 0x14c   : > { %v531_v37 = vadd.f32 %v530_v32, %v465_v25  ;;  %919 = vmatmul.f32.gmra.mxu3 %v3674_v40 }
 0x14d   : > { %955 = vst [vmem:[%s2825_s23 + $0xa0] sm:$0xff] %v2965_v31  ;;  %854 = vmatmul.f32.gmra.mxu2 %v3673_v36 }
 0x14e   : > { %789 = vmatmul.f32.gmra.mxu1 %v3675_v41 }
 0x14f   : > { %v660_v45 = vpop.f32.mrf.mxu3 }
 0x150   : > { %v595_v42 = vpop.f32.mrf.mxu2  ;;  %v468_v46 = vpop.f32.mrf.mxu0 }
 0x151   : > { %v596_v44 = vadd.f32 %v595_v42, %v531_v37 }
 0x153   : > { %v2973_v47 = vadd.f32 %v660_v45, %v596_v44  ;;  %v533_v48 = vpop.f32.mrf.mxu1  ;;  %727 = vmatmul.f32.gmra.mxu0 %v2689_v10 }
 0x154   : > { %v534_v49 = vadd.f32 %v533_v48, %v468_v46  ;;  %922 = vmatmul.f32.gmra.mxu3 %v2697_v6 }
 0x155   : > { %957 = vst [vmem:[%s2825_s23 + $0xb0] sm:$0xff] %v2973_v47  ;;  %857 = vmatmul.f32.gmra.mxu2 %v2692_v38 }
 0x156   : > { %792 = vmatmul.f32.gmra.mxu1 %v2702_v29 }
 0x157   : > { %v663_v52 = vpop.f32.mrf.mxu3 }
 0x158   : > { %v598_v50 = vpop.f32.mrf.mxu2  ;;  %v471_v53 = vpop.f32.mrf.mxu0 }
 0x159   : > { %v599_v51 = vadd.f32 %v598_v50, %v534_v49 }
 0x15b   : > { %v2981_v55 = vadd.f32 %v663_v52, %v599_v51  ;;  %v536_v56 = vpop.f32.mrf.mxu1  ;;  %730 = vmatmul.f32.gmra.mxu0 %v2717_v0 }
 0x15c   : > { %v537_v10 = vadd.f32 %v536_v56, %v471_v53  ;;  %925 = vmatmul.f32.gmra.mxu3 %v2725_v4 }
 0x15d   : > { %959 = vst [vmem:[%s2825_s23 + $0xc0] sm:$0xff] %v2981_v55  ;;  %860 = vmatmul.f32.gmra.mxu2 %v2720_v3 }
 0x15e   : > { %795 = vmatmul.f32.gmra.mxu1 %v2730_v7 }
 0x15f   : > { %v666_v38 = vpop.f32.mrf.mxu3 }
 0x160   : > { %v601_v6 = vpop.f32.mrf.mxu2  ;;  %v474_v57 = vpop.f32.mrf.mxu0 }
 0x161   : > { %v602_v29 = vadd.f32 %v601_v6, %v537_v10 }
 0x163   : > { %v2989_v59 = vadd.f32 %v666_v38, %v602_v29  ;;  %v539_v61 = vpop.f32.mrf.mxu1  ;;  %733 = vmatmul.f32.gmra.mxu0 %v2745_v8 }
 0x164   : > { %v540_v0 = vadd.f32 %v539_v61, %v474_v57  ;;  %928 = vmatmul.f32.gmra.mxu3 %v2753_v12 }
 0x165   : > { %961 = vst [vmem:[%s2825_s23 + $0xd0] sm:$0xff] %v2989_v59  ;;  %863 = vmatmul.f32.gmra.mxu2 %v2748_v11 }
 0x166   : > { %798 = vmatmul.f32.gmra.mxu1 %v2758_v13 }
 0x167   : > { %v669_v7 = vpop.f32.mrf.mxu3 }
 0x168   : > { %v604_v3 = vpop.f32.mrf.mxu2  ;;  %v477_v62 = vpop.f32.mrf.mxu0 }
 0x169   : > { %v605_v4 = vadd.f32 %v604_v3, %v540_v0 }
 0x16b   : > { %v2997_v63 = vadd.f32 %v669_v7, %v605_v4  ;;  %v542_v2 = vpop.f32.mrf.mxu1  ;;  %736 = vmatmul.f32.gmra.mxu0 %v2773_v5 }
 0x16c   : > { %v543_v8 = vadd.f32 %v542_v2, %v477_v62  ;;  %931 = vmatmul.f32.gmra.mxu3 %v2781_v15 }
 0x16d   : > { %963 = vst [vmem:[%s2825_s23 + $0xe0] sm:$0xff] %v2997_v63  ;;  %866 = vmatmul.f32.gmra.mxu2 %v2776_v14 }
 0x16e   : > { %801 = vmatmul.f32.gmra.mxu1 %v2786_v16 }
 0x16f   : > { %v672_v13 = vpop.f32.mrf.mxu3 }
 0x170   : > { %v607_v11 = vpop.f32.mrf.mxu2  ;;  %v692_v17 = vpop.f32.mrf.mxu0 }
 0x171   : > { %v608_v12 = vadd.f32 %v607_v11, %v543_v8 }
 0x173   : > { %v3005_v18 = vadd.f32 %v672_v13, %v608_v12  ;;  %v757_v20 = vpop.f32.mrf.mxu1  ;;  %983 = vmatmul.f32.vlgmr.msra.gmra.mxu0 %v2819_v34 }
 0x174   : > { %v758_v5 = vadd.f32 %v757_v20, %v692_v17 }
 0x175   : > { %965 = vst [vmem:[%s2825_s23 + $0xf0] sm:$0xff] %v3005_v18  ;;  %1113 = vmatmul.f32.vlgmr.msra.gmra.mxu2 %v2819_v34 }
 0x177   : > { %v887_v15 = vpop.f32.mrf.mxu3 }
 0x178   : > { %v822_v14 = vpop.f32.mrf.mxu2  ;;  %v695_v16 = vpop.f32.mrf.mxu0 }
 0x179   : > { %v823_v21 = vadd.f32 %v822_v14, %v758_v5 }
 0x17b   : > { %v3011_v22 = vadd.f32 %v887_v15, %v823_v21  ;;  %v760_v23 = vpop.f32.mrf.mxu1  ;;  %986 = vmatmul.f32.gmra.mxu0 %v2841_v58 }
 0x17c   : > { %v761_v24 = vadd.f32 %v760_v23, %v695_v16 }
 0x17d   : > { %936 = vst [vmem:[%s2825_s23 + $0x8] sm:$0xff] %v3011_v22  ;;  %1048 = vmatmul.f32.vlgmr.msra.gmra.mxu1 %v3011_v22  ;;  %1116 = vmatmul.f32.gmra.mxu2 %v2841_v58 }
 0x17e   : > { %1178 = vmatmul.f32.vlgmr.msra.gmra.mxu3 %v3011_v22 }
 0x17f   : > { %v890_v27 = vpop.f32.mrf.mxu3 }
 0x180   : > { %v825_v26 = vpop.f32.mrf.mxu2  ;;  %v698_v30 = vpop.f32.mrf.mxu0 }
 0x181   : > { %v826_v9 = vadd.f32 %v825_v26, %v761_v24 }
 0x183   : > { %v3019_v25 = vadd.f32 %v890_v27, %v826_v9  ;;  %v763_v32 = vpop.f32.mrf.mxu1  ;;  %989 = vmatmul.f32.gmra.mxu0 %v2861_v35 }
 0x184   : > { %v764_v33 = vadd.f32 %v763_v32, %v698_v30 }
 0x185   : > { %938 = vst [vmem:[%s2825_s23 + $0x18] sm:$0xff] %v3019_v25  ;;  %1051 = vmatmul.f32.gmra.mxu1 %v3019_v25  ;;  %1119 = vmatmul.f32.gmra.mxu2 %v2861_v35 }
 0x186   : > { %1181 = vmatmul.f32.gmra.mxu3 %v3019_v25 }
 0x187   : > { %v893_v40 = vpop.f32.mrf.mxu3 }
 0x188   : > { %v828_v36 = vpop.f32.mrf.mxu2  ;;  %v701_v41 = vpop.f32.mrf.mxu0 }
 0x189   : > { %v829_v37 = vadd.f32 %v828_v36, %v764_v33 }
 0x18b   : > { %v3027_v42 = vadd.f32 %v893_v40, %v829_v37  ;;  %v766_v44 = vpop.f32.mrf.mxu1  ;;  %992 = vmatmul.f32.gmra.mxu0 %v2881_v60 }
 0x18c   : > { %v767_v45 = vadd.f32 %v766_v44, %v701_v41 }
 0x18d   : > { %940 = vst [vmem:[%s2825_s23 + $0x28] sm:$0xff] %v3027_v42  ;;  %1054 = vmatmul.f32.gmra.mxu1 %v3027_v42  ;;  %1122 = vmatmul.f32.gmra.mxu2 %v2881_v60 }
 0x18e   : > { %1184 = vmatmul.f32.gmra.mxu3 %v3027_v42 }
 0x18f   : > { %v896_v49 = vpop.f32.mrf.mxu3 }
 0x190   : > { %v831_v46 = vpop.f32.mrf.mxu2  ;;  %v704_v50 = vpop.f32.mrf.mxu0 }
 0x191   : > { %v832_v48 = vadd.f32 %v831_v46, %v767_v45 }
 0x193   : > { %v3035_v51 = vadd.f32 %v896_v49, %v832_v48  ;;  %v769_v52 = vpop.f32.mrf.mxu1  ;;  %995 = vmatmul.f32.gmra.mxu0 %v2901_v39 }
 0x194   : > { %v770_v53 = vadd.f32 %v769_v52, %v704_v50 }
 0x195   : > { %942 = vst [vmem:[%s2825_s23 + $0x38] sm:$0xff] %v3035_v51  ;;  %1057 = vmatmul.f32.gmra.mxu1 %v3035_v51  ;;  %1125 = vmatmul.f32.gmra.mxu2 %v2901_v39 }
 0x196   : > { %1187 = vmatmul.f32.gmra.mxu3 %v3035_v51 }
 0x197   : > { %v899_v6 = vpop.f32.mrf.mxu3 }
 0x198   : > { %v834_v56 = vpop.f32.mrf.mxu2  ;;  %v707_v29 = vpop.f32.mrf.mxu0 }
 0x199   : > { %v835_v10 = vadd.f32 %v834_v56, %v770_v53 }
 0x19b   : > { %v3043_v38 = vadd.f32 %v899_v6, %v835_v10  ;;  %v772_v57 = vpop.f32.mrf.mxu1  ;;  %998 = vmatmul.f32.gmra.mxu0 %v2921_v1 }
 0x19c   : > { %v773_v61 = vadd.f32 %v772_v57, %v707_v29 }
 0x19d   : > { %944 = vst [vmem:[%s2825_s23 + $0x48] sm:$0xff] %v3043_v38  ;;  %1060 = vmatmul.f32.gmra.mxu1 %v3043_v38  ;;  %1128 = vmatmul.f32.gmra.mxu2 %v2921_v1 }
 0x19e   : > { %1190 = vmatmul.f32.gmra.mxu3 %v3043_v38 }
 0x19f   : > { %v902_v4 = vpop.f32.mrf.mxu3 }
 0x1a0   : > { %v837_v0 = vpop.f32.mrf.mxu2  ;;  %v710_v7 = vpop.f32.mrf.mxu0 }
 0x1a1   : > { %v838_v3 = vadd.f32 %v837_v0, %v773_v61 }
 0x1a3   : > { %v3051_v62 = vadd.f32 %v902_v4, %v838_v3  ;;  %v775_v2 = vpop.f32.mrf.mxu1  ;;  %1001 = vmatmul.f32.gmra.mxu0 %v2933_v28 }
 0x1a4   : > { %v776_v8 = vadd.f32 %v775_v2, %v710_v7 }
 0x1a5   : > { %946 = vst [vmem:[%s2825_s23 + $0x58] sm:$0xff] %v3051_v62  ;;  %1063 = vmatmul.f32.gmra.mxu1 %v3051_v62  ;;  %1131 = vmatmul.f32.gmra.mxu2 %v2933_v28 }
 0x1a6   : > { %1193 = vmatmul.f32.gmra.mxu3 %v3051_v62 }
 0x1a7   : > { %v905_v13 = vpop.f32.mrf.mxu3 }
 0x1a8   : > { %v840_v11 = vpop.f32.mrf.mxu2  ;;  %v713_v17 = vpop.f32.mrf.mxu0 }
 0x1a9   : > { %v841_v12 = vadd.f32 %v840_v11, %v776_v8 }
 0x1ab   : > { %v3059_v20 = vadd.f32 %v905_v13, %v841_v12  ;;  %v778_v5 = vpop.f32.mrf.mxu1  ;;  %1004 = vmatmul.f32.gmra.mxu0 %v2941_v43 }
 0x1ac   : > { %v779_v14 = vadd.f32 %v778_v5, %v713_v17 }
 0x1ad   : > { %948 = vst [vmem:[%s2825_s23 + $0x68] sm:$0xff] %v3059_v20  ;;  %1066 = vmatmul.f32.gmra.mxu1 %v3059_v20  ;;  %1134 = vmatmul.f32.gmra.mxu2 %v2941_v43 }
 0x1ae   : > { %1196 = vmatmul.f32.gmra.mxu3 %v3059_v20 }
 0x1af   : > { %v908_v16 = vpop.f32.mrf.mxu3 }
 0x1b0   : > { %v843_v21 = vpop.f32.mrf.mxu2  ;;  %v716_v23 = vpop.f32.mrf.mxu0 }
 0x1b1   : > { %v844_v15 = vadd.f32 %v843_v21, %v779_v14 }
 0x1b3   : > { %v3067_v24 = vadd.f32 %v908_v16, %v844_v15  ;;  %v781_v26 = vpop.f32.mrf.mxu1  ;;  %1007 = vmatmul.f32.gmra.mxu0 %v2949_v54 }
 0x1b4   : > { %v782_v9 = vadd.f32 %v781_v26, %v716_v23 }
 0x1b5   : > { %950 = vst [vmem:[%s2825_s23 + $0x78] sm:$0xff] %v3067_v24  ;;  %1069 = vmatmul.f32.gmra.mxu1 %v3067_v24  ;;  %1137 = vmatmul.f32.gmra.mxu2 %v2949_v54 }
 0x1b6   : > { %1199 = vmatmul.f32.gmra.mxu3 %v3067_v24 }
 0x1b7   : > { %v911_v32 = vpop.f32.mrf.mxu3 }
 0x1b8   : > { %v846_v27 = vpop.f32.mrf.mxu2  ;;  %v719_v33 = vpop.f32.mrf.mxu0 }
 0x1b9   : > { %v847_v30 = vadd.f32 %v846_v27, %v782_v9 }
 0x1bb   : > { %v3075_v36 = vadd.f32 %v911_v32, %v847_v30  ;;  %v784_v37 = vpop.f32.mrf.mxu1  ;;  %1010 = vmatmul.f32.gmra.mxu0 %v2957_v19 }
 0x1bc   : > { %v785_v40 = vadd.f32 %v784_v37, %v719_v33 }
 0x1bd   : > { %952 = vst [vmem:[%s2825_s23 + $0x88] sm:$0xff] %v3075_v36  ;;  %1072 = vmatmul.f32.gmra.mxu1 %v3075_v36  ;;  %1140 = vmatmul.f32.gmra.mxu2 %v2957_v19 }
 0x1be   : > { %1202 = vmatmul.f32.gmra.mxu3 %v3075_v36 }
 0x1bf   : > { %v914_v45 = vpop.f32.mrf.mxu3 }
 0x1c0   : > { %v849_v41 = vpop.f32.mrf.mxu2  ;;  %v722_v46 = vpop.f32.mrf.mxu0 }
 0x1c1   : > { %v850_v44 = vadd.f32 %v849_v41, %v785_v40 }
 0x1c3   : > { %v3083_v48 = vadd.f32 %v914_v45, %v850_v44  ;;  %v787_v49 = vpop.f32.mrf.mxu1  ;;  %1013 = vmatmul.f32.gmra.mxu0 %v2965_v31 }
 0x1c4   : > { %v788_v50 = vadd.f32 %v787_v49, %v722_v46 }
 0x1c5   : > { %954 = vst [vmem:[%s2825_s23 + $0x98] sm:$0xff] %v3083_v48  ;;  %1075 = vmatmul.f32.gmra.mxu1 %v3083_v48  ;;  %1143 = vmatmul.f32.gmra.mxu2 %v2965_v31 }
 0x1c6   : > { %1205 = vmatmul.f32.gmra.mxu3 %v3083_v48 }
 0x1c7   : > { %v917_v56 = vpop.f32.mrf.mxu3 }
 0x1c8   : > { %v852_v52 = vpop.f32.mrf.mxu2  ;;  %v725_v10 = vpop.f32.mrf.mxu0 }
 0x1c9   : > { %v853_v53 = vadd.f32 %v852_v52, %v788_v50 }
 0x1cb   : > { %v3091_v6 = vadd.f32 %v917_v56, %v853_v53  ;;  %v790_v29 = vpop.f32.mrf.mxu1  ;;  %1016 = vmatmul.f32.gmra.mxu0 %v2973_v47 }
 0x1cc   : > { %v791_v57 = vadd.f32 %v790_v29, %v725_v10 }
 0x1cd   : > { %956 = vst [vmem:[%s2825_s23 + $0xa8] sm:$0xff] %v3091_v6  ;;  %1078 = vmatmul.f32.gmra.mxu1 %v3091_v6  ;;  %1146 = vmatmul.f32.gmra.mxu2 %v2973_v47 }
 0x1ce   : > { %1208 = vmatmul.f32.gmra.mxu3 %v3091_v6 }
 0x1cf   : > { %v920_v3 = vpop.f32.mrf.mxu3 }
 0x1d0   : > { %v855_v61 = vpop.f32.mrf.mxu2  ;;  %v728_v4 = vpop.f32.mrf.mxu0 }
 0x1d1   : > { %v856_v0 = vadd.f32 %v855_v61, %v791_v57 }
 0x1d3   : > { %v3099_v7 = vadd.f32 %v920_v3, %v856_v0  ;;  %v793_v2 = vpop.f32.mrf.mxu1  ;;  %1019 = vmatmul.f32.gmra.mxu0 %v2981_v55 }
 0x1d4   : > { %v794_v8 = vadd.f32 %v793_v2, %v728_v4 }
 0x1d5   : > { %958 = vst [vmem:[%s2825_s23 + $0xb8] sm:$0xff] %v3099_v7  ;;  %1081 = vmatmul.f32.gmra.mxu1 %v3099_v7  ;;  %1149 = vmatmul.f32.gmra.mxu2 %v2981_v55 }
 0x1d6   : > { %1211 = vmatmul.f32.gmra.mxu3 %v3099_v7 }
 0x1d7   : > { %v923_v13 = vpop.f32.mrf.mxu3 }
 0x1d8   : > { %v858_v11 = vpop.f32.mrf.mxu2  ;;  %v731_v17 = vpop.f32.mrf.mxu0 }
 0x1d9   : > { %v859_v12 = vadd.f32 %v858_v11, %v794_v8 }
 0x1db   : > { %v3107_v5 = vadd.f32 %v923_v13, %v859_v12  ;;  %v796_v14 = vpop.f32.mrf.mxu1  ;;  %1022 = vmatmul.f32.gmra.mxu0 %v2989_v59 }
 0x1dc   : > { %v797_v21 = vadd.f32 %v796_v14, %v731_v17 }
 0x1dd   : > { %960 = vst [vmem:[%s2825_s23 + $0xc8] sm:$0xff] %v3107_v5  ;;  %1084 = vmatmul.f32.gmra.mxu1 %v3107_v5  ;;  %1152 = vmatmul.f32.gmra.mxu2 %v2989_v59 }
 0x1de   : > { %1214 = vmatmul.f32.gmra.mxu3 %v3107_v5 }
 0x1df   : > { %v926_v23 = vpop.f32.mrf.mxu3 }
 0x1e0   : > { %v861_v15 = vpop.f32.mrf.mxu2  ;;  %v734_v26 = vpop.f32.mrf.mxu0 }
 0x1e1   : > { %v862_v16 = vadd.f32 %v861_v15, %v797_v21 }
 0x1e3   : > { %v3115_v9 = vadd.f32 %v926_v23, %v862_v16  ;;  %v799_v27 = vpop.f32.mrf.mxu1  ;;  %1025 = vmatmul.f32.gmra.mxu0 %v2997_v63 }
 0x1e4   : > { %v800_v30 = vadd.f32 %v799_v27, %v734_v26 }
 0x1e5   : > { %962 = vst [vmem:[%s2825_s23 + $0xd8] sm:$0xff] %v3115_v9  ;;  %1087 = vmatmul.f32.gmra.mxu1 %v3115_v9  ;;  %1155 = vmatmul.f32.gmra.mxu2 %v2997_v63 }
 0x1e6   : > { %1217 = vmatmul.f32.gmra.mxu3 %v3115_v9 }
 0x1e7   : > { %v929_v37 = vpop.f32.mrf.mxu3 }
 0x1e8   : > { %v864_v32 = vpop.f32.mrf.mxu2  ;;  %v737_v40 = vpop.f32.mrf.mxu0 }
 0x1e9   : > { %v865_v33 = vadd.f32 %v864_v32, %v800_v30 }
 0x1eb   : > { %v3123_v41 = vadd.f32 %v929_v37, %v865_v33  ;;  %v802_v44 = vpop.f32.mrf.mxu1  ;;  %1028 = vmatmul.f32.gmra.mxu0 %v3005_v18 }
 0x1ec   : > { %v803_v45 = vadd.f32 %v802_v44, %v737_v40 }
 0x1ed   : > { %964 = vst [vmem:[%s2825_s23 + $0xe8] sm:$0xff] %v3123_v41  ;;  %1090 = vmatmul.f32.gmra.mxu1 %v3123_v41  ;;  %1158 = vmatmul.f32.gmra.mxu2 %v3005_v18 }
 0x1ee   : > { %1220 = vmatmul.f32.gmra.mxu3 %v3123_v41 }
 0x1ef   : > { %v932_v50 = vpop.f32.mrf.mxu3 }
 0x1f0   : > { %v867_v46 = vpop.f32.mrf.mxu2  ;;  %v984_v52 = vpop.f32.mrf.mxu0 }
 0x1f1   : > { %v868_v49 = vadd.f32 %v867_v46, %v803_v45 }
 0x1f3   : > { %v3131_v53 = vadd.f32 %v932_v50, %v868_v49  ;;  %1243 = vmatmul.f32.vlgmr.msrb.gmra.mxu0 %v2819_v34 }
 0x1f5   : > { %966 = vst [vmem:[%s2825_s23 + $0xf8] sm:$0xff] %v3131_v53  ;;  %1093 = vmatmul.f32.gmra.mxu1 %v3131_v53  ;;  %1373 = vmatmul.f32.vlgmr.msrb.gmra.mxu2 %v2819_v34 }
 0x1f6   : > { %1223 = vmatmul.f32.gmra.mxu3 %v3131_v53 }
 0x1f8   : > { %v1114_v56 = vpop.f32.mrf.mxu2  ;;  %v987_v10 = vpop.f32.mrf.mxu0 }
 0x1fa   : > { %v1049_v29 = vpop.f32.mrf.mxu1 }
 0x1fb   : > { %v1050_v57 = vadd.f32 %v1049_v29, %v984_v52  ;;  %1246 = vmatmul.f32.gmra.mxu0 %v2841_v58 }
 0x1fd   : > { %1487 = vst [vmem:[%s3141_s27] sm:$0xff] %v1050_v57  ;;  %1308 = vmatmul.f32.vlgmr.msrb.gmra.mxu1 %v3011_v22  ;;  %1376 = vmatmul.f32.gmra.mxu2 %v2841_v58 }
 0x1fe   : > { %1438 = vmatmul.f32.vlgmr.msrb.gmra.mxu3 %v3011_v22 }
 0x200   : > { %v1117_v34 = vpop.f32.mrf.mxu2  ;;  %v990_v3 = vpop.f32.mrf.mxu0 }
 0x201   : > { %v1179_v61 = vpop.f32.mrf.mxu3 }
 0x202   : > { %v1180_v0 = vadd.f32 %v1179_v61, %v1114_v56  ;;  %v1052_v4 = vpop.f32.mrf.mxu1 }
 0x203   : > { %v1053_v2 = vadd.f32 %v1052_v4, %v987_v10  ;;  %1249 = vmatmul.f32.gmra.mxu0 %v2861_v35 }
 0x204   : > { %1488 = vst [vmem:[%s3141_s27 + $0x8] sm:$0xff] %v1180_v0 }
 0x205   : > { %1491 = vst [vmem:[%s3141_s27 + $0x20] sm:$0xff] %v1053_v2  ;;  %1311 = vmatmul.f32.gmra.mxu1 %v3019_v25  ;;  %1379 = vmatmul.f32.gmra.mxu2 %v2861_v35 }
 0x206   : > { %1441 = vmatmul.f32.gmra.mxu3 %v3019_v25 }
 0x208   : > { %v1120_v58 = vpop.f32.mrf.mxu2  ;;  %v993_v11 = vpop.f32.mrf.mxu0 }
 0x209   : > { %v1182_v22 = vpop.f32.mrf.mxu3 }
 0x20a   : > { %v1183_v8 = vadd.f32 %v1182_v22, %v1117_v34  ;;  %v1055_v12 = vpop.f32.mrf.mxu1 }
 0x20b   : > { %v1056_v13 = vadd.f32 %v1055_v12, %v990_v3  ;;  %1252 = vmatmul.f32.gmra.mxu0 %v2881_v60 }
 0x20c   : > { %1492 = vst [vmem:[%s3141_s27 + $0x28] sm:$0xff] %v1183_v8 }
 0x20d   : > { %1495 = vst [vmem:[%s3141_s27 + $0x40] sm:$0xff] %v1056_v13  ;;  %1314 = vmatmul.f32.gmra.mxu1 %v3027_v42  ;;  %1382 = vmatmul.f32.gmra.mxu2 %v2881_v60 }
 0x20e   : > { %1444 = vmatmul.f32.gmra.mxu3 %v3027_v42 }
 0x210   : > { %v1123_v35 = vpop.f32.mrf.mxu2  ;;  %v996_v14 = vpop.f32.mrf.mxu0 }
 0x211   : > { %v1185_v25 = vpop.f32.mrf.mxu3 }
 0x212   : > { %v1186_v17 = vadd.f32 %v1185_v25, %v1120_v58  ;;  %v1058_v21 = vpop.f32.mrf.mxu1 }
 0x213   : > { %v1059_v15 = vadd.f32 %v1058_v21, %v993_v11  ;;  %1255 = vmatmul.f32.gmra.mxu0 %v2901_v39 }
 0x214   : > { %1496 = vst [vmem:[%s3141_s27 + $0x48] sm:$0xff] %v1186_v17 }
 0x215   : > { %1499 = vst [vmem:[%s3141_s27 + $0x60] sm:$0xff] %v1059_v15  ;;  %1317 = vmatmul.f32.gmra.mxu1 %v3035_v51  ;;  %1385 = vmatmul.f32.gmra.mxu2 %v2901_v39 }
 0x216   : > { %1447 = vmatmul.f32.gmra.mxu3 %v3035_v51 }
 0x218   : > { %v1126_v60 = vpop.f32.mrf.mxu2  ;;  %v999_v23 = vpop.f32.mrf.mxu0 }
 0x219   : > { %v1188_v42 = vpop.f32.mrf.mxu3 }
 0x21a   : > { %v1189_v16 = vadd.f32 %v1188_v42, %v1123_v35  ;;  %v1061_v26 = vpop.f32.mrf.mxu1 }
 0x21b   : > { %v1062_v27 = vadd.f32 %v1061_v26, %v996_v14  ;;  %1258 = vmatmul.f32.gmra.mxu0 %v2921_v1 }
 0x21c   : > { %1500 = vst [vmem:[%s3141_s27 + $0x68] sm:$0xff] %v1189_v16 }
 0x21d   : > { %1503 = vst [vmem:[%s3141_s27 + $0x80] sm:$0xff] %v1062_v27  ;;  %1320 = vmatmul.f32.gmra.mxu1 %v3043_v38  ;;  %1388 = vmatmul.f32.gmra.mxu2 %v2921_v1 }
 0x21e   : > { %1450 = vmatmul.f32.gmra.mxu3 %v3043_v38 }
 0x220   : > { %v1129_v39 = vpop.f32.mrf.mxu2  ;;  %v1002_v32 = vpop.f32.mrf.mxu0 }
 0x221   : > { %v1191_v51 = vpop.f32.mrf.mxu3 }
 0x222   : > { %v1192_v30 = vadd.f32 %v1191_v51, %v1126_v60  ;;  %v1064_v33 = vpop.f32.mrf.mxu1 }
 0x223   : > { %v1065_v37 = vadd.f32 %v1064_v33, %v999_v23  ;;  %1261 = vmatmul.f32.gmra.mxu0 %v2933_v28 }
 0x224   : > { %1504 = vst [vmem:[%s3141_s27 + $0x88] sm:$0xff] %v1192_v30 }
 0x225   : > { %1507 = vst [vmem:[%s3141_s27 + $0xa0] sm:$0xff] %v1065_v37  ;;  %1323 = vmatmul.f32.gmra.mxu1 %v3051_v62  ;;  %1391 = vmatmul.f32.gmra.mxu2 %v2933_v28 }
 0x226   : > { %1453 = vmatmul.f32.gmra.mxu3 %v3051_v62 }
 0x228   : > { %v1132_v1 = vpop.f32.mrf.mxu2  ;;  %v1005_v44 = vpop.f32.mrf.mxu0 }
 0x229   : > { %v1194_v38 = vpop.f32.mrf.mxu3 }
 0x22a   : > { %v1195_v40 = vadd.f32 %v1194_v38, %v1129_v39  ;;  %v1067_v45 = vpop.f32.mrf.mxu1 }
 0x22b   : > { %v1068_v46 = vadd.f32 %v1067_v45, %v1002_v32  ;;  %1264 = vmatmul.f32.gmra.mxu0 %v2941_v43 }
 0x22c   : > { %1508 = vst [vmem:[%s3141_s27 + $0xa8] sm:$0xff] %v1195_v40 }
 0x22d   : > { %1511 = vst [vmem:[%s3141_s27 + $0xc0] sm:$0xff] %v1068_v46  ;;  %1326 = vmatmul.f32.gmra.mxu1 %v3059_v20  ;;  %1394 = vmatmul.f32.gmra.mxu2 %v2941_v43 }
 0x22e   : > { %1456 = vmatmul.f32.gmra.mxu3 %v3059_v20 }
 0x230   : > { %v1135_v28 = vpop.f32.mrf.mxu2  ;;  %v1008_v50 = vpop.f32.mrf.mxu0 }
 0x231   : > { %v1197_v62 = vpop.f32.mrf.mxu3 }
 0x232   : > { %v1198_v49 = vadd.f32 %v1197_v62, %v1132_v1  ;;  %v1070_v52 = vpop.f32.mrf.mxu1 }
 0x233   : > { %v1071_v56 = vadd.f32 %v1070_v52, %v1005_v44  ;;  %1267 = vmatmul.f32.gmra.mxu0 %v2949_v54 }
 0x234   : > { %1512 = vst [vmem:[%s3141_s27 + $0xc8] sm:$0xff] %v1198_v49 }
 0x235   : > { %1515 = vst [vmem:[%s3141_s27 + $0xe0] sm:$0xff] %v1071_v56  ;;  %1329 = vmatmul.f32.gmra.mxu1 %v3067_v24  ;;  %1397 = vmatmul.f32.gmra.mxu2 %v2949_v54 }
 0x236   : > { %1459 = vmatmul.f32.gmra.mxu3 %v3067_v24 }
 0x238   : > { %v1138_v43 = vpop.f32.mrf.mxu2  ;;  %v1011_v29 = vpop.f32.mrf.mxu0 }
 0x239   : > { %v1200_v20 = vpop.f32.mrf.mxu3 }
 0x23a   : > { %v1201_v10 = vadd.f32 %v1200_v20, %v1135_v28  ;;  %v1073_v57 = vpop.f32.mrf.mxu1 }
 0x23b   : > { %v1074_v34 = vadd.f32 %v1073_v57, %v1008_v50  ;;  %1270 = vmatmul.f32.gmra.mxu0 %v2957_v19 }
 0x23c   : > { %1516 = vst [vmem:[%s3141_s27 + $0xe8] sm:$0xff] %v1201_v10 }
 0x23d   : > { %1519 = vst [vmem:[%s3141_s27 + $0x100] sm:$0xff] %v1074_v34  ;;  %1332 = vmatmul.f32.gmra.mxu1 %v3075_v36  ;;  %1400 = vmatmul.f32.gmra.mxu2 %v2957_v19 }
 0x23e   : > { %1462 = vmatmul.f32.gmra.mxu3 %v3075_v36 }
 0x240   : > { %v1141_v54 = vpop.f32.mrf.mxu2  ;;  %v1014_v0 = vpop.f32.mrf.mxu0 }
 0x241   : > { %v1203_v24 = vpop.f32.mrf.mxu3 }
 0x242   : > { %v1204_v61 = vadd.f32 %v1203_v24, %v1138_v43  ;;  %v1076_v3 = vpop.f32.mrf.mxu1 }
 0x243   : > { %v1077_v4 = vadd.f32 %v1076_v3, %v1011_v29  ;;  %1273 = vmatmul.f32.gmra.mxu0 %v2965_v31 }
 0x244   : > { %1520 = vst [vmem:[%s3141_s27 + $0x108] sm:$0xff] %v1204_v61 }
 0x245   : > { %1523 = vst [vmem:[%s3141_s27 + $0x120] sm:$0xff] %v1077_v4  ;;  %1335 = vmatmul.f32.gmra.mxu1 %v3083_v48  ;;  %1403 = vmatmul.f32.gmra.mxu2 %v2965_v31 }
 0x246   : > { %1465 = vmatmul.f32.gmra.mxu3 %v3083_v48 }
 0x248   : > { %v1144_v19 = vpop.f32.mrf.mxu2  ;;  %v1017_v58 = vpop.f32.mrf.mxu0 }
 0x249   : > { %v1206_v36 = vpop.f32.mrf.mxu3 }
 0x24a   : > { %v1207_v2 = vadd.f32 %v1206_v36, %v1141_v54  ;;  %v1079_v22 = vpop.f32.mrf.mxu1 }
 0x24b   : > { %v1080_v8 = vadd.f32 %v1079_v22, %v1014_v0  ;;  %1276 = vmatmul.f32.gmra.mxu0 %v2973_v47 }
 0x24c   : > { %1524 = vst [vmem:[%s3141_s27 + $0x128] sm:$0xff] %v1207_v2 }
 0x24d   : > { %1527 = vst [vmem:[%s3141_s27 + $0x140] sm:$0xff] %v1080_v8  ;;  %1338 = vmatmul.f32.gmra.mxu1 %v3091_v6  ;;  %1406 = vmatmul.f32.gmra.mxu2 %v2973_v47 }
 0x24e   : > { %1468 = vmatmul.f32.gmra.mxu3 %v3091_v6 }
 0x250   : > { %v1147_v31 = vpop.f32.mrf.mxu2  ;;  %v1020_v12 = vpop.f32.mrf.mxu0 }
 0x251   : > { %v1209_v48 = vpop.f32.mrf.mxu3 }
 0x252   : > { %v1210_v11 = vadd.f32 %v1209_v48, %v1144_v19  ;;  %v1082_v13 = vpop.f32.mrf.mxu1 }
 0x253   : > { %v1083_v35 = vadd.f32 %v1082_v13, %v1017_v58  ;;  %1279 = vmatmul.f32.gmra.mxu0 %v2981_v55 }
 0x254   : > { %1528 = vst [vmem:[%s3141_s27 + $0x148] sm:$0xff] %v1210_v11 }
 0x255   : > { %1531 = vst [vmem:[%s3141_s27 + $0x160] sm:$0xff] %v1083_v35  ;;  %1341 = vmatmul.f32.gmra.mxu1 %v3099_v7  ;;  %1409 = vmatmul.f32.gmra.mxu2 %v2981_v55 }
 0x256   : > { %1471 = vmatmul.f32.gmra.mxu3 %v3099_v7 }
 0x258   : > { %v1150_v47 = vpop.f32.mrf.mxu2  ;;  %v1023_v17 = vpop.f32.mrf.mxu0 }
 0x259   : > { %v1212_v6 = vpop.f32.mrf.mxu3 }
 0x25a   : > { %v1213_v25 = vadd.f32 %v1212_v6, %v1147_v31  ;;  %v1085_v14 = vpop.f32.mrf.mxu1 }
 0x25b   : > { %v1086_v21 = vadd.f32 %v1085_v14, %v1020_v12  ;;  %1282 = vmatmul.f32.gmra.mxu0 %v2989_v59 }
 0x25c   : > { %1532 = vst [vmem:[%s3141_s27 + $0x168] sm:$0xff] %v1213_v25 }
 0x25d   : > { %1535 = vst [vmem:[%s3141_s27 + $0x180] sm:$0xff] %v1086_v21  ;;  %1344 = vmatmul.f32.gmra.mxu1 %v3107_v5  ;;  %1412 = vmatmul.f32.gmra.mxu2 %v2989_v59 }
 0x25e   : > { %1474 = vmatmul.f32.gmra.mxu3 %v3107_v5 }
 0x260   : > { %v1153_v55 = vpop.f32.mrf.mxu2  ;;  %v1026_v60 = vpop.f32.mrf.mxu0 }
 0x261   : > { %v1215_v7 = vpop.f32.mrf.mxu3 }
 0x262   : > { %v1216_v15 = vadd.f32 %v1215_v7, %v1150_v47  ;;  %v1088_v42 = vpop.f32.mrf.mxu1 }
 0x263   : > { %v1089_v16 = vadd.f32 %v1088_v42, %v1023_v17  ;;  %1285 = vmatmul.f32.gmra.mxu0 %v2997_v63 }
 0x264   : > { %1536 = vst [vmem:[%s3141_s27 + $0x188] sm:$0xff] %v1216_v15 }
 0x265   : > { %1539 = vst [vmem:[%s3141_s27 + $0x1a0] sm:$0xff] %v1089_v16  ;;  %1347 = vmatmul.f32.gmra.mxu1 %v3115_v9  ;;  %1415 = vmatmul.f32.gmra.mxu2 %v2997_v63 }
 0x266   : > { %1477 = vmatmul.f32.gmra.mxu3 %v3115_v9 }
 0x268   : > { %v1156_v59 = vpop.f32.mrf.mxu2  ;;  %v1029_v26 = vpop.f32.mrf.mxu0 }
 0x269   : > { %v1218_v5 = vpop.f32.mrf.mxu3 }
 0x26a   : > { %v1219_v23 = vadd.f32 %v1218_v5, %v1153_v55  ;;  %v1091_v27 = vpop.f32.mrf.mxu1 }
 0x26b   : > { %v1092_v39 = vadd.f32 %v1091_v27, %v1026_v60  ;;  %1288 = vmatmul.f32.gmra.mxu0 %v3005_v18 }
 0x26c   : > { %1540 = vst [vmem:[%s3141_s27 + $0x1a8] sm:$0xff] %v1219_v23 }
 0x26d   : > { %1543 = vst [vmem:[%s3141_s27 + $0x1c0] sm:$0xff] %v1092_v39  ;;  %1350 = vmatmul.f32.gmra.mxu1 %v3123_v41  ;;  %1418 = vmatmul.f32.gmra.mxu2 %v3005_v18 }
 0x26e   : > { %1480 = vmatmul.f32.gmra.mxu3 %v3123_v41 }
 0x270   : > { %v1159_v63 = vpop.f32.mrf.mxu2  ;;  %v1244_v32 = vpop.f32.mrf.mxu0 }
 0x271   : > { %v1221_v9 = vpop.f32.mrf.mxu3 }
 0x272   : > { %v1222_v51 = vadd.f32 %v1221_v9, %v1156_v59  ;;  %v1094_v30 = vpop.f32.mrf.mxu1 }
 0x273   : > { %v1095_v33 = vadd.f32 %v1094_v30, %v1029_v26 }
 0x274   : > { %1544 = vst [vmem:[%s3141_s27 + $0x1c8] sm:$0xff] %v1222_v51 }
 0x275   : > { %1547 = vst [vmem:[%s3141_s27 + $0x1e0] sm:$0xff] %v1095_v33  ;;  %1353 = vmatmul.f32.gmra.mxu1 %v3131_v53 }
 0x276   : > { %1483 = vmatmul.f32.gmra.mxu3 %v3131_v53 }
 0x278   : > { %v1374_v18 = vpop.f32.mrf.mxu2  ;;  %v1247_v1 = vpop.f32.mrf.mxu0 }
 0x279   : > { %v1224_v37 = vpop.f32.mrf.mxu3 }
 0x27a   : > { %v1225_v41 = vadd.f32 %v1224_v37, %v1159_v63  ;;  %v1309_v38 = vpop.f32.mrf.mxu1 }
 0x27b   : > { %v1310_v40 = vadd.f32 %v1309_v38, %v1244_v32 }
 0x27c   : > { %1548 = vst [vmem:[%s3141_s27 + $0x1e8] sm:$0xff] %v1225_v41 }
 0x27d   : > { %1489 = vst [vmem:[%s3141_s27 + $0x10] sm:$0xff] %v1310_v40 }
 0x27e   : > { %1891 = shalt.err (!%p1888_p10)
}
 0x27f   : > { %s1971_s18 = smov 256   ;;  %s1972_s23 = smov 16  }
 0x280   : > { %1742 = dma.vmem_to_hbm [thread:$0]  (%p2064_p3), %s1571_s24, 4096, %s1573_s29, %s1552_s30, %s1971_s18, %s1971_s18, %s1972_s23   ;;  %v1377_v53 = vpop.f32.mrf.mxu2  ;;  %v1250_v46 = vpop.f32.mrf.mxu0 }
 0x281   : > { %v1439_v44 = vpop.f32.mrf.mxu3  ;;  %s1735_s28 = sshll.u32 %s2016_s16, 9  ;;  %s1588_s24 = sshll.u32 %s3141_s27, 4  ;;  %s1589_s24 = int_to_ptr.vmem [resolvable:$true] %s1588_s24 }
 0x282   : > { %v1440_v45 = vadd.f32 %v1439_v44, %v1374_v18  ;;  %v1312_v28 = vpop.f32.mrf.mxu1  ;;  %s1587_s22 = scalar_lea.hbm %s3322_s3, %s1735_s28  ;;  %s1557_s16 = scalar_lea.sflag [#allocation9], %s2094_s6 }
 0x283   : > { %v1313_v62 = vadd.f32 %v1312_v28, %v1247_v1  ;;  %s1590_s29 = sshll.u32 %s1587_s22, 4  ;;  %s1912_s10 = scalar_lea.hbm %s3322_s3, 1024  ;;  %s1591_s29 = int_to_ptr.hbm [resolvable:$true] %s1590_s29 }
 0x284   : > { %1490 = vst [vmem:[%s3141_s27 + $0x18] sm:$0xff] %v1440_v45  ;;  %s1906_s30 = sshra.s32 %s1591_s29, 4  ;;  %s1907_s30 = int_to_ptr.hbm [resolvable:$true] %s1906_s30 }
 0x285   : > { %1493 = vst [vmem:[%s3141_s27 + $0x30] sm:$0xff] %v1313_v62  ;;  %s1908_s7 = scalar_lea.hbm %s1907_s30, 512  ;;  %p1913_p5 = scmp.lt.s32.totalorder %s1907_s30, %s3322_s3 }
 0x286   : > { %p1909_p12 = scmp.ne.s32.totalorder %s1907_s30, %s1908_s7  ;;  %p1914_p7 = scmp.lt.s32.totalorder %s1912_s10, %s1908_s7 }
 0x288   : > { %v1380_v49 = vpop.f32.mrf.mxu2  ;;  %v1253_v56 = vpop.f32.mrf.mxu0  ;;  %p1910_p13 = pnand %p1909_p12, %p2064_p3  ;;  %p1915_p1 = por %p1914_p7, %p1913_p5 }
 0x289   : > { %v1442_v50 = vpop.f32.mrf.mxu3 }
 0x28a   : > { %v1443_v52 = vadd.f32 %v1442_v50, %v1377_v53  ;;  %v1315_v43 = vpop.f32.mrf.mxu1  ;;  %p1911_p0 = pneg %p1910_p13 }
 0x28b   : > { %v1316_v20 = vadd.f32 %v1315_v43, %v1250_v46 }
 0x28c   : > { %1494 = vst [vmem:[%s3141_s27 + $0x38] sm:$0xff] %v1443_v52  ;;  %p1916_p4 = pnand %p1915_p1, %p1911_p0 }
 0x28d   : > { %1497 = vst [vmem:[%s3141_s27 + $0x50] sm:$0xff] %v1316_v20 }
 0x290   : > { %v1383_v10 = vpop.f32.mrf.mxu2  ;;  %v1256_v34 = vpop.f32.mrf.mxu0 }
 0x291   : > { %v1445_v29 = vpop.f32.mrf.mxu3 }
 0x292   : > { %v1446_v57 = vadd.f32 %v1445_v29, %v1380_v49  ;;  %v1318_v54 = vpop.f32.mrf.mxu1 }
 0x293   : > { %v1319_v24 = vadd.f32 %v1318_v54, %v1253_v56 }
 0x294   : > { %1498 = vst [vmem:[%s3141_s27 + $0x58] sm:$0xff] %v1446_v57 }
 0x295   : > { %1501 = vst [vmem:[%s3141_s27 + $0x70] sm:$0xff] %v1319_v24 }
 0x298   : > { %v1386_v61 = vpop.f32.mrf.mxu2  ;;  %v1259_v4 = vpop.f32.mrf.mxu0 }
 0x299   : > { %v1448_v0 = vpop.f32.mrf.mxu3 }
 0x29a   : > { %v1449_v3 = vadd.f32 %v1448_v0, %v1383_v10  ;;  %v1321_v19 = vpop.f32.mrf.mxu1 }
 0x29b   : > { %v1322_v36 = vadd.f32 %v1321_v19, %v1256_v34 }
 0x29c   : > { %1502 = vst [vmem:[%s3141_s27 + $0x78] sm:$0xff] %v1449_v3 }
 0x29d   : > { %1505 = vst [vmem:[%s3141_s27 + $0x90] sm:$0xff] %v1322_v36 }
 0x2a0   : > { %v1389_v2 = vpop.f32.mrf.mxu2  ;;  %v1262_v8 = vpop.f32.mrf.mxu0 }
 0x2a1   : > { %v1451_v58 = vpop.f32.mrf.mxu3 }
 0x2a2   : > { %v1452_v22 = vadd.f32 %v1451_v58, %v1386_v61  ;;  %v1324_v31 = vpop.f32.mrf.mxu1 }
 0x2a3   : > { %v1325_v48 = vadd.f32 %v1324_v31, %v1259_v4 }
 0x2a4   : > { %1506 = vst [vmem:[%s3141_s27 + $0x98] sm:$0xff] %v1452_v22 }
 0x2a5   : > { %1509 = vst [vmem:[%s3141_s27 + $0xb0] sm:$0xff] %v1325_v48 }
 0x2a8   : > { %v1392_v11 = vpop.f32.mrf.mxu2  ;;  %v1265_v35 = vpop.f32.mrf.mxu0 }
 0x2a9   : > { %v1454_v12 = vpop.f32.mrf.mxu3 }
 0x2aa   : > { %v1455_v13 = vadd.f32 %v1454_v12, %v1389_v2  ;;  %v1327_v47 = vpop.f32.mrf.mxu1 }
 0x2ab   : > { %v1328_v6 = vadd.f32 %v1327_v47, %v1262_v8 }
 0x2ac   : > { %1510 = vst [vmem:[%s3141_s27 + $0xb8] sm:$0xff] %v1455_v13 }
 0x2ad   : > { %1513 = vst [vmem:[%s3141_s27 + $0xd0] sm:$0xff] %v1328_v6 }
 0x2b0   : > { %v1395_v25 = vpop.f32.mrf.mxu2  ;;  %v1268_v21 = vpop.f32.mrf.mxu0 }
 0x2b1   : > { %v1457_v17 = vpop.f32.mrf.mxu3 }
 0x2b2   : > { %v1458_v14 = vadd.f32 %v1457_v17, %v1392_v11  ;;  %v1330_v55 = vpop.f32.mrf.mxu1 }
 0x2b3   : > { %v1331_v7 = vadd.f32 %v1330_v55, %v1265_v35 }
 0x2b4   : > { %1514 = vst [vmem:[%s3141_s27 + $0xd8] sm:$0xff] %v1458_v14 }
 0x2b5   : > { %1517 = vst [vmem:[%s3141_s27 + $0xf0] sm:$0xff] %v1331_v7 }
 0x2b8   : > { %v1398_v15 = vpop.f32.mrf.mxu2  ;;  %v1271_v16 = vpop.f32.mrf.mxu0 }
 0x2b9   : > { %v1460_v60 = vpop.f32.mrf.mxu3 }
 0x2ba   : > { %v1461_v42 = vadd.f32 %v1460_v60, %v1395_v25  ;;  %v1333_v59 = vpop.f32.mrf.mxu1 }
 0x2bb   : > { %v1334_v5 = vadd.f32 %v1333_v59, %v1268_v21 }
 0x2bc   : > { %1518 = vst [vmem:[%s3141_s27 + $0xf8] sm:$0xff] %v1461_v42 }
 0x2bd   : > { %1521 = vst [vmem:[%s3141_s27 + $0x110] sm:$0xff] %v1334_v5 }
 0x2c0   : > { %v1401_v23 = vpop.f32.mrf.mxu2  ;;  %v1274_v39 = vpop.f32.mrf.mxu0 }
 0x2c1   : > { %v1463_v26 = vpop.f32.mrf.mxu3 }
 0x2c2   : > { %v1464_v27 = vadd.f32 %v1463_v26, %v1398_v15  ;;  %v1336_v63 = vpop.f32.mrf.mxu1 }
 0x2c3   : > { %v1337_v9 = vadd.f32 %v1336_v63, %v1271_v16 }
 0x2c4   : > { %1522 = vst [vmem:[%s3141_s27 + $0x118] sm:$0xff] %v1464_v27 }
 0x2c5   : > { %1525 = vst [vmem:[%s3141_s27 + $0x130] sm:$0xff] %v1337_v9 }
 0x2c8   : > { %v1404_v51 = vpop.f32.mrf.mxu2  ;;  %v1277_v33 = vpop.f32.mrf.mxu0 }
 0x2c9   : > { %v1466_v30 = vpop.f32.mrf.mxu3 }
 0x2ca   : > { %v1467_v32 = vadd.f32 %v1466_v30, %v1401_v23  ;;  %v1339_v37 = vpop.f32.mrf.mxu1 }
 0x2cb   : > { %v1340_v18 = vadd.f32 %v1339_v37, %v1274_v39 }
 0x2cc   : > { %1526 = vst [vmem:[%s3141_s27 + $0x138] sm:$0xff] %v1467_v32 }
 0x2cd   : > { %1529 = vst [vmem:[%s3141_s27 + $0x150] sm:$0xff] %v1340_v18 }
 0x2d0   : > { %v1407_v41 = vpop.f32.mrf.mxu2  ;;  %v1280_v44 = vpop.f32.mrf.mxu0 }
 0x2d1   : > { %v1469_v1 = vpop.f32.mrf.mxu3 }
 0x2d2   : > { %v1470_v38 = vadd.f32 %v1469_v1, %v1404_v51  ;;  %v1342_v40 = vpop.f32.mrf.mxu1 }
 0x2d3   : > { %v1343_v53 = vadd.f32 %v1342_v40, %v1277_v33 }
 0x2d4   : > { %1530 = vst [vmem:[%s3141_s27 + $0x158] sm:$0xff] %v1470_v38 }
 0x2d5   : > { %1533 = vst [vmem:[%s3141_s27 + $0x170] sm:$0xff] %v1343_v53 }
 0x2d8   : > { %v1410_v62 = vpop.f32.mrf.mxu2  ;;  %v1283_v50 = vpop.f32.mrf.mxu0 }
 0x2d9   : > { %v1472_v45 = vpop.f32.mrf.mxu3 }
 0x2da   : > { %v1473_v46 = vadd.f32 %v1472_v45, %v1407_v41  ;;  %v1345_v28 = vpop.f32.mrf.mxu1 }
 0x2db   : > { %v1346_v49 = vadd.f32 %v1345_v28, %v1280_v44 }
 0x2dc   : > { %1534 = vst [vmem:[%s3141_s27 + $0x178] sm:$0xff] %v1473_v46 }
 0x2dd   : > { %1537 = vst [vmem:[%s3141_s27 + $0x190] sm:$0xff] %v1346_v49 }
 0x2e0   : > { %v1413_v10 = vpop.f32.mrf.mxu2  ;;  %v1286_v29 = vpop.f32.mrf.mxu0 }
 0x2e1   : > { %v1475_v52 = vpop.f32.mrf.mxu3 }
 0x2e2   : > { %v1476_v56 = vadd.f32 %v1475_v52, %v1410_v62  ;;  %v1348_v43 = vpop.f32.mrf.mxu1 }
 0x2e3   : > { %v1349_v20 = vadd.f32 %v1348_v43, %v1283_v50 }
 0x2e4   : > { %1538 = vst [vmem:[%s3141_s27 + $0x198] sm:$0xff] %v1476_v56 }
 0x2e5   : > { %1541 = vst [vmem:[%s3141_s27 + $0x1b0] sm:$0xff] %v1349_v20 }
 0x2e8   : > { %v1416_v61 = vpop.f32.mrf.mxu2  ;;  %v1289_v3 = vpop.f32.mrf.mxu0 }
 0x2e9   : > { %v1478_v57 = vpop.f32.mrf.mxu3 }
 0x2ea   : > { %v1479_v34 = vadd.f32 %v1478_v57, %v1413_v10  ;;  %v1351_v54 = vpop.f32.mrf.mxu1 }
 0x2eb   : > { %v1352_v24 = vadd.f32 %v1351_v54, %v1286_v29 }
 0x2ec   : > { %1542 = vst [vmem:[%s3141_s27 + $0x1b8] sm:$0xff] %v1479_v34 }
 0x2ed   : > { %1545 = vst [vmem:[%s3141_s27 + $0x1d0] sm:$0xff] %v1352_v24 }
 0x2f0   : > { %v1419_v2 = vpop.f32.mrf.mxu2 }
 0x2f1   : > { %v1481_v0 = vpop.f32.mrf.mxu3 }
 0x2f2   : > { %v1482_v4 = vadd.f32 %v1481_v0, %v1416_v61  ;;  %v1354_v19 = vpop.f32.mrf.mxu1 }
 0x2f3   : > { %v1355_v36 = vadd.f32 %v1354_v19, %v1289_v3 }
 0x2f4   : > { %1546 = vst [vmem:[%s3141_s27 + $0x1d8] sm:$0xff] %v1482_v4 }
 0x2f5   : > { %1549 = vst [vmem:[%s3141_s27 + $0x1f0] sm:$0xff] %v1355_v36 }
 0x2f9   : > { %v1484_v58 = vpop.f32.mrf.mxu3 }
 0x2fa   : > { %v1485_v22 = vadd.f32 %v1484_v58, %v1419_v2 }
 0x2fc   : > { %1550 = vst [vmem:[%s3141_s27 + $0x1f8] sm:$0xff] %v1485_v22 }
 0x2fd   : > { %1919 = shalt.err (!%p1916_p4)
}
 0x2fe   : > { %s1973_s6 = smov 512   ;;  %s1974_s27 = smov 32  }
 0x2ff   : > { %1743 = dma.vmem_to_hbm [thread:$0]  (%p2064_p3), %s1589_s24, 8192, %s1591_s29, %s1557_s16, %s1973_s6, %s1973_s6, %s1974_s27  }
 0x300 PF: > { %s1605_s25 = sand.u32 1, %s1954_s12   ;;  %p3676_p8 = scmp.ge.s32.totalorder %s1966_s15, 2 }
 0x301   : > { %s1606_s18 = scalar_lea.sflag [#allocation4], %s1605_s25 }
 0x302   : > { %p1755_p11 = pnand %p3676_p8, %p2030_p6 }
 0x304   : > { %p1756_p9 = pneg %p1755_p11 }
 0x306   : > { %1945 = dma.done.wait (%p1756_p9), %s1606_s18, 4096  }
 0x307   : > { %1947 = vsyncadd (%p1756_p9), %s1606_s18, 4294963200  ;;  %s1616_s23 = scalar_lea.sflag [#allocation9], %s1605_s25 }
 0x308   : > { %1949 = dma.done.wait (%p1756_p9), %s1616_s23, 8192  }
 0x309   : > { %1951 = vsyncadd (%p1756_p9), %s1616_s23, 4294959104  ;;  %p21_p3 = scmp.ge.s32.totalorder %s2048_s26, 4   ;;  %s3677_s12 = smov %s1958_s13 }
 0x30a   : > { %s3678_s13 = smov %s1962_s14  ;;  %s3679_s14 = smov %s2060_s4 }
 0x30b   : > { %s3680_s15 = smov %s2048_s26  ;;  %23 = sbr.rel (!%p21_p3) target bundleno = 8 (0x8), region = 94 }
 0x310   :  { %1622 = vsyncpa [#allocation3], 1 }
 0x311   :  { %1624 = vsyncpa [#allocation3 + $0x1], 1 }
 0x312   :  { %1625 = vsyncpa [#allocation6], 1 }
 0x313   :  { %1626 = vsyncpa [#allocation4], 1 }
 0x314   :  { %1628 = vsyncpa [#allocation4 + $0x1], 1 }
 0x315   :  { %1629 = vsyncpa [#allocation9], 1 }
 0x316   :  { %1631 = vsyncpa [#allocation9 + $0x1], 1 }

</bundles_post_ra>
